<compile_context>
chip_gen: v7x
topology: tpu7x:2x2x1
jax: 0.10.0
libtpu: 0.0.40
codegen_flags: <defaults>
</compile_context>

<pallas_src>
import jax
import jax.numpy as jnp
from jax.experimental import pallas as pl
from jax.experimental.pallas import tpu as pltpu


def _sigmoid(x):
    # tanh-form sigmoid: one EUP push per call on all generations.
    return 0.5 * (jnp.tanh(0.5 * x) + 1.0)


# -----------------------------------------------------------------------------
# Recurrent kernel.  grid = (batch_blocks [parallel], time_chunks [arbitrary]).
# Inputs are the precomputed layer-1 pre-activations; only the truly sequential
# matmuls remain inside the loop.  Recurrent state is held in the resident
# (constant-time-index) hn/cn output blocks.
# -----------------------------------------------------------------------------
def _lstm_recurrent_kernel(xg_ref,              # (CHUNK, Bb, 4H)  x @ W_ih1^T + b1
                           whh1_ref,            # (H, 4H)          layer-1 W_hh^T
                           w2_ref,              # (2H, 4H)         layer-2 [W_ih^T; W_hh^T]
                           b2_ref,              # (1, 4H)          layer-2 bias
                           h2_seq_ref,          # (CHUNK, Bb, H)   layer-2 hidden, all steps
                           hn_ref, cn_ref):     # (2, Bb, H)       final (resident) state
    t_chunk = pl.program_id(1)
    chunk = xg_ref.shape[0]
    bb = xg_ref.shape[1]
    H = hn_ref.shape[-1]

    @pl.when(t_chunk == 0)
    def _():
        hn_ref[...] = jnp.zeros_like(hn_ref)
        cn_ref[...] = jnp.zeros_like(cn_ref)

    def cell(gates, c_prev):
        # PyTorch gate order: i, f, g, o.
        i = _sigmoid(gates[:, 0 * H:1 * H])
        f = _sigmoid(gates[:, 1 * H:2 * H])
        g = jnp.tanh(gates[:, 2 * H:3 * H])
        o = _sigmoid(gates[:, 3 * H:4 * H])
        c_new = f * c_prev + i * g
        h_new = o * jnp.tanh(c_new)
        return h_new, c_new

    # Hoist weight loads and bias broadcast out of the unrolled loop.
    whh1 = whh1_ref[...]
    w2 = w2_ref[...]
    b2 = jnp.broadcast_to(b2_ref[...], (bb, 4 * H))

    h1, c1 = hn_ref[0], cn_ref[0]
    h2, c2 = hn_ref[1], cn_ref[1]

    # Small fixed chunk -> fully unrolled, static indices.
    for s in range(chunk):
        # Layer 1: x-part precomputed outside; only the recurrent matmul remains.
        gates1 = xg_ref[s] + jnp.dot(h1, whh1, preferred_element_type=jnp.float32)
        h1, c1 = cell(gates1, c1)
        # Layer 2: fused [h1, h2] @ [W_ih2^T; W_hh2^T] (single MXU push).
        # (inter-layer dropout is identity in eval mode)
        gates2 = jnp.dot(jnp.concatenate([h1, h2], axis=-1), w2,
                         preferred_element_type=jnp.float32) + b2
        h2, c2 = cell(gates2, c2)
        h2_seq_ref[s] = h2.astype(h2_seq_ref.dtype)

    hn_ref[0] = h1
    hn_ref[1] = h2
    cn_ref[0] = c1
    cn_ref[1] = c2


# -----------------------------------------------------------------------------
# Hoisted FC projection: parallel-tiled Pallas matmul (rows x vocab tiles).
# -----------------------------------------------------------------------------
def _fc_kernel(h_ref, w_ref, b_ref, o_ref):
    o_ref[...] = (jnp.dot(h_ref[...], w_ref[...],
                          preferred_element_type=jnp.float32)
                  + b_ref[...]).astype(o_ref.dtype)


def _fc_pallas(h, w_t, b):
    """h: (M, H) f32, w_t: (H, V), b: (1, V)  ->  (M, V) f32."""
    M, H = h.shape
    V = w_t.shape[1]
    Mp = ((M + 7) // 8) * 8
    Vp = ((V + 127) // 128) * 128          # lane-dense output tiles (unmasked vst)
    if Mp != M:
        h = jnp.pad(h, ((0, Mp - M), (0, 0)))
    if Vp != V:
        w_t = jnp.pad(w_t, ((0, 0), (0, Vp - V)))
        b = jnp.pad(b, ((0, 0), (0, Vp - V)))

    tm = next(t for t in (256, 128, 64, 32, 16, 8) if Mp % t == 0)
    tv = next(t for t in (1024, 512, 256, 128) if Vp % t == 0)

    out = pl.pallas_call(
        _fc_kernel,
        out_shape=jax.ShapeDtypeStruct((Mp, Vp), jnp.float32),
        grid_spec=pltpu.PrefetchScalarGridSpec(
            num_scalar_prefetch=0,
            grid=(Mp // tm, Vp // tv),
            in_specs=[
                pl.BlockSpec((tm, H), lambda i, j: (i, 0)),
                pl.BlockSpec((H, tv), lambda i, j: (0, j)),
                pl.BlockSpec((1, tv), lambda i, j: (0, j)),
            ],
            out_specs=pl.BlockSpec((tm, tv), lambda i, j: (i, j)),
        ),
        compiler_params=pltpu.CompilerParams(
            dimension_semantics=("parallel", "parallel")),
    )(h, w_t, b)
    return out[:M, :V]


# -----------------------------------------------------------------------------
# Wrapper: embedding gather + hoisted x-projection (glue) -> recurrent Pallas
# kernel -> hoisted FC Pallas kernel.
# -----------------------------------------------------------------------------
def kieu_lstm_forward(tokens, params):
    """tokens: int32 (B, T).  Returns (logits (B, T, V), (h_n, c_n) each (2, B, H))."""
    emb_table = params["embedding"]                       # (V, E)
    B, T = tokens.shape
    H = params["w_hh1_t"].shape[0]
    V = params["w_fc_t"].shape[1]

    # Embedding gather, produced directly time-major (we transpose the tiny
    # int token matrix, not the activation tensor).  Dropout: eval identity.
    emb_tm = jnp.take(emb_table, tokens.T, axis=0)        # (T, B, E)

    # Pad batch to the sublane width (multiple of 8).
    B_pad = max(8, ((B + 7) // 8) * 8)
    if B_pad != B:
        emb_tm = jnp.pad(emb_tm, ((0, 0), (0, B_pad - B), (0, 0)))

    # Hoisted layer-1 input projection: ONE big matmul over all timesteps.
    xg = (jnp.einsum("tbe,eg->tbg", emb_tm, params["w_ih1_t"])
          + params["b1"]).astype(jnp.float32)             # (T, B_pad, 4H)

    # Time chunking + optional batch sharding across TensorCores (v7x).
    chunk = next(c for c in (16, 8, 4, 2, 1) if T % c == 0)
    b_block = B_pad // 2 if (B_pad >= 16 and B_pad % 16 == 0) else B_pad
    n_b = B_pad // b_block

    h2_seq, h_n, c_n = pl.pallas_call(
        _lstm_recurrent_kernel,
        out_shape=(
            jax.ShapeDtypeStruct((T, B_pad, H), jnp.float32),
            jax.ShapeDtypeStruct((2, B_pad, H), jnp.float32),
            jax.ShapeDtypeStruct((2, B_pad, H), jnp.float32),
        ),
        grid_spec=pltpu.PrefetchScalarGridSpec(
            num_scalar_prefetch=0,
            grid=(n_b, T // chunk),
            in_specs=[
                pl.BlockSpec((chunk, b_block, 4 * H), lambda b, c: (c, b, 0)),
                pl.BlockSpec((H, 4 * H), lambda b, c: (0, 0)),
                pl.BlockSpec((2 * H, 4 * H), lambda b, c: (0, 0)),
                pl.BlockSpec((1, 4 * H), lambda b, c: (0, 0)),
            ],
            out_specs=(
                pl.BlockSpec((chunk, b_block, H), lambda b, c: (c, b, 0)),
                pl.BlockSpec((2, b_block, H), lambda b, c: (0, b, 0)),
                pl.BlockSpec((2, b_block, H), lambda b, c: (0, b, 0)),
            ),
        ),
        compiler_params=pltpu.CompilerParams(
            dimension_semantics=("parallel", "arbitrary")),
    )(xg, params["w_hh1_t"], params["w2_t"], params["b2"])

    # Hoisted FC: one parallel-tiled matmul.  Only the small hidden tensor is
    # transposed to batch-first; the (B, T, V) logits come out already batch-first.
    # Output dropout is identity in eval mode.
    h2_bt = jnp.transpose(h2_seq[:, :B, :], (1, 0, 2)).reshape(B * T, H)
    logits = _fc_pallas(h2_bt, params["w_fc_t"], params["b_fc"]).reshape(B, T, V)

    return logits, (h_n[:, :B, :], c_n[:, :B, :])


# -----------------------------------------------------------------------------
# Deterministic synthetic parameter initialization (matches module shapes).
# -----------------------------------------------------------------------------
def init_params(key, vocab_size, embedding_dim, hidden_dim):
    V, E, H = vocab_size, embedding_dim, hidden_dim
    k = 1.0 / jnp.sqrt(jnp.float32(H))
    keys = jax.random.split(key, 12)

    def u(kk, shape):
        return jax.random.uniform(kk, shape, jnp.float32, -k, k)

    # nn.Embedding default init ~ N(0, 1)
    embedding = jax.random.normal(keys[0], (V, E), jnp.float32)

    # Layer 1: W_ih (4H, E), W_hh (4H, H), biases (4H,)
    w_ih1 = u(keys[1], (4 * H, E))
    w_hh1 = u(keys[2], (4 * H, H))
    b1 = u(keys[3], (4 * H,)) + u(keys[4], (4 * H,))      # b_ih + b_hh combined
    # Layer 2: input is H-dim
    w_ih2 = u(keys[5], (4 * H, H))
    w_hh2 = u(keys[6], (4 * H, H))
    b2 = u(keys[7], (4 * H,)) + u(keys[8], (4 * H,))
    # FC: (V, H) + (V,)
    w_fc = u(keys[9], (V, H))
    b_fc = u(keys[10], (V,))

    return {
        "embedding": embedding,
        "w_ih1_t": w_ih1.T,                                # (E, 4H)
        "w_hh1_t": w_hh1.T,                                # (H, 4H)
        "b1": b1[None, :],                                 # (1, 4H)
        "w2_t": jnp.concatenate([w_ih2.T, w_hh2.T], 0),    # (2H, 4H) fused layer-2 weight
        "b2": b2[None, :],                                 # (1, 4H)
        "w_fc_t": w_fc.T,                                  # (H, V)
        "b_fc": b_fc[None, :],                             # (1, V)
    }


if __name__ == "__main__":
    VOCAB, EMB, HID = 64, 32, 32
    BATCH, SEQ = 2, 8

    key = jax.random.PRNGKey(0)
    pkey, tkey = jax.random.split(key)
    params = init_params(pkey, VOCAB, EMB, HID)
    tokens = jax.random.randint(tkey, (BATCH, SEQ), 0, VOCAB, dtype=jnp.int32)

    logits, (h_n, c_n) = jax.jit(kieu_lstm_forward)(tokens, params)
    jax.block_until_ready((logits, h_n, c_n))

    assert logits.shape == (BATCH, SEQ, VOCAB)
    assert h_n.shape == (2, BATCH, HID) and c_n.shape == (2, BATCH, HID)
    assert bool(jnp.all(jnp.isfinite(logits)))
    print("KERNEL_OK")
</pallas_src>

<mosaic_0001>
module attributes {stable_mosaic.version = 11 : i64} {
  func.func @_fc_kernel(%arg0: i32, %arg1: i32, %arg2: memref<16x32xf32, #tpu.memory_space<vmem>>, %arg3: memref<32x128xf32, #tpu.memory_space<vmem>>, %arg4: memref<1x128xf32, #tpu.memory_space<vmem>>, %arg5: memref<16x128xf32, #tpu.memory_space<vmem>>) attributes {dimension_semantics = [#tpu.dimension_semantics<parallel>, #tpu.dimension_semantics<parallel>], iteration_bounds = array<i64: 1, 1>, scalar_prefetch = 0 : i64, scratch_operands = 0 : i64, tpu.core_type = #tpu.core_type<tc>, window_params = [{transform_indices = @transform_0, window_bounds = array<i64: 16, 32>}, {transform_indices = @transform_1, window_bounds = array<i64: 32, 128>}, {transform_indices = @transform_2, window_bounds = array<i64: 1, 128>}, {transform_indices = @transform_3, window_bounds = array<i64: 16, 128>}]} {
    %c0 = arith.constant 0 : index
    %c0_0 = arith.constant 0 : index
    %0 = vector.load %arg2[%c0, %c0_0] : memref<16x32xf32, #tpu.memory_space<vmem>>, vector<16x32xf32>
    %c0_1 = arith.constant 0 : index
    %c0_2 = arith.constant 0 : index
    %1 = vector.load %arg3[%c0_1, %c0_2] : memref<32x128xf32, #tpu.memory_space<vmem>>, vector<32x128xf32>
    %cst = arith.constant dense<0.000000e+00> : vector<16x128xf32>
    %2 = tpu.matmul %0, %1, %cst {dimension_numbers = #tpu.dot_dimension_numbers<[1], [0], [0], [1], [0, 0, 1, 1], [], []>} : vector<16x32xf32>, vector<32x128xf32>, vector<16x128xf32> -> vector<16x128xf32>
    %c0_3 = arith.constant 0 : index
    %c0_4 = arith.constant 0 : index
    %3 = vector.load %arg4[%c0_3, %c0_4] : memref<1x128xf32, #tpu.memory_space<vmem>>, vector<1x128xf32>
    %4 = vector.broadcast %3 : vector<1x128xf32> to vector<16x128xf32>
    %5 = arith.addf %2, %4 : vector<16x128xf32>
    %c0_5 = arith.constant 0 : index
    %c0_6 = arith.constant 0 : index
    %6 = vector.load %arg5[%c0_5, %c0_6] : memref<16x128xf32, #tpu.memory_space<vmem>>, vector<16x128xf32>
    tpu.vector_store %arg5[%c0_5, %c0_6], %5 {strides = array<i32>} : memref<16x128xf32, #tpu.memory_space<vmem>>, vector<16x128xf32>,
    return
  }
  func.func @transform_0(%arg0: i32, %arg1: i32) -> (i32, i32) {
    %c0_i32 = arith.constant 0 : i32
    %c0_i32_0 = arith.constant 0 : i32
    return %arg0, %c0_i32 : i32, i32
  }
  func.func @transform_1(%arg0: i32, %arg1: i32) -> (i32, i32) {
    %c0_i32 = arith.constant 0 : i32
    %c0_i32_0 = arith.constant 0 : i32
    return %c0_i32, %arg1 : i32, i32
  }
  func.func @transform_2(%arg0: i32, %arg1: i32) -> (i32, i32) {
    %c0_i32 = arith.constant 0 : i32
    %c0_i32_0 = arith.constant 0 : i32
    return %c0_i32, %arg1 : i32, i32
  }
  func.func @transform_3(%arg0: i32, %arg1: i32) -> (i32, i32) {
    %c0_i32 = arith.constant 0 : i32
    return %arg0, %arg1 : i32, i32
  }
}

module attributes {stable_mosaic.version = 11 : i64} {
  func.func @_lstm_recurrent_kernel(%arg0: i32, %arg1: i32, %arg2: memref<8x8x128xf32, #tpu.memory_space<vmem>>, %arg3: memref<32x128xf32, #tpu.memory_space<vmem>>, %arg4: memref<64x128xf32, #tpu.memory_space<vmem>>, %arg5: memref<1x128xf32, #tpu.memory_space<vmem>>, %arg6: memref<8x8x32xf32, #tpu.memory_space<vmem>>, %arg7: memref<2x8x32xf32, #tpu.memory_space<vmem>>, %arg8: memref<2x8x32xf32, #tpu.memory_space<vmem>>) attributes {dimension_semantics = [#tpu.dimension_semantics<parallel>, #tpu.dimension_semantics<arbitrary>], iteration_bounds = array<i64: 1, 1>, scalar_prefetch = 0 : i64, scratch_operands = 0 : i64, tpu.core_type = #tpu.core_type<tc>, window_params = [{transform_indices = @transform_0, window_bounds = array<i64: 8, 8, 128>}, {pipeline_mode = #tpu.pipeline_mode<synchronous>, transform_indices = @transform_1, window_bounds = array<i64: 32, 128>}, {pipeline_mode = #tpu.pipeline_mode<synchronous>, transform_indices = @transform_2, window_bounds = array<i64: 64, 128>}, {pipeline_mode = #tpu.pipeline_mode<synchronous>, transform_indices = @transform_3, window_bounds = array<i64: 1, 128>}, {transform_indices = @transform_4, window_bounds = array<i64: 8, 8, 32>}, {transform_indices = @transform_5, window_bounds = array<i64: 2, 8, 32>}, {transform_indices = @transform_6, window_bounds = array<i64: 2, 8, 32>}]} {
    %c0_i32 = arith.constant 0 : i32
    %0 = arith.cmpi eq, %arg1, %c0_i32 : i32
    %1 = arith.extui %0 : i1 to i32
    %c0_i32_0 = arith.constant 0 : i32
    %2 = arith.cmpi ne, %1, %c0_i32_0 : i32
    scf.if %2 {
      %cst_230 = arith.constant 0.000000e+00 : f32
      %604 = vector.broadcast %cst_230 : f32 to vector<2x8x32xf32>
      %c0_231 = arith.constant 0 : index
      %c0_232 = arith.constant 0 : index
      %c0_233 = arith.constant 0 : index
      %605 = vector.load %arg7[%c0_231, %c0_232, %c0_233] : memref<2x8x32xf32, #tpu.memory_space<vmem>>, vector<2x8x32xf32>
      tpu.vector_store %arg7[%c0_231, %c0_232, %c0_233], %604 {strides = array<i32>} : memref<2x8x32xf32, #tpu.memory_space<vmem>>, vector<2x8x32xf32>,
      %cst_234 = arith.constant 0.000000e+00 : f32
      %606 = vector.broadcast %cst_234 : f32 to vector<2x8x32xf32>
      %c0_235 = arith.constant 0 : index
      %c0_236 = arith.constant 0 : index
      %c0_237 = arith.constant 0 : index
      %607 = vector.load %arg8[%c0_235, %c0_236, %c0_237] : memref<2x8x32xf32, #tpu.memory_space<vmem>>, vector<2x8x32xf32>
      tpu.vector_store %arg8[%c0_235, %c0_236, %c0_237], %606 {strides = array<i32>} : memref<2x8x32xf32, #tpu.memory_space<vmem>>, vector<2x8x32xf32>,
    } else {
    }
    %c0 = arith.constant 0 : index
    %c0_1 = arith.constant 0 : index
    %3 = vector.load %arg3[%c0, %c0_1] : memref<32x128xf32, #tpu.memory_space<vmem>>, vector<32x128xf32>
    %c0_2 = arith.constant 0 : index
    %c0_3 = arith.constant 0 : index
    %4 = vector.load %arg4[%c0_2, %c0_3] : memref<64x128xf32, #tpu.memory_space<vmem>>, vector<64x128xf32>
    %c0_4 = arith.constant 0 : index
    %c0_5 = arith.constant 0 : index
    %5 = vector.load %arg5[%c0_4, %c0_5] : memref<1x128xf32, #tpu.memory_space<vmem>>, vector<1x128xf32>
    %6 = vector.shape_cast %5 : vector<1x128xf32> to vector<1x128xf32>
    %7 = vector.broadcast %6 : vector<1x128xf32> to vector<8x128xf32>
    %c0_6 = arith.constant 0 : index
    %c0_7 = arith.constant 0 : index
    %c0_8 = arith.constant 0 : index
    %8 = vector.load %arg7[%c0_6, %c0_7, %c0_8] : memref<2x8x32xf32, #tpu.memory_space<vmem>>, vector<1x8x32xf32>
    %9 = vector.shape_cast %8 : vector<1x8x32xf32> to vector<8x32xf32>
    %c0_9 = arith.constant 0 : index
    %c0_10 = arith.constant 0 : index
    %c0_11 = arith.constant 0 : index
    %10 = vector.load %arg8[%c0_9, %c0_10, %c0_11] : memref<2x8x32xf32, #tpu.memory_space<vmem>>, vector<1x8x32xf32>
    %11 = vector.shape_cast %10 : vector<1x8x32xf32> to vector<8x32xf32>
    %c1 = arith.constant 1 : index
    %c0_12 = arith.constant 0 : index
    %c0_13 = arith.constant 0 : index
    %12 = vector.load %arg7[%c1, %c0_12, %c0_13] : memref<2x8x32xf32, #tpu.memory_space<vmem>>, vector<1x8x32xf32>
    %13 = vector.shape_cast %12 : vector<1x8x32xf32> to vector<8x32xf32>
    %c1_14 = arith.constant 1 : index
    %c0_15 = arith.constant 0 : index
    %c0_16 = arith.constant 0 : index
    %14 = vector.load %arg8[%c1_14, %c0_15, %c0_16] : memref<2x8x32xf32, #tpu.memory_space<vmem>>, vector<1x8x32xf32>
    %15 = vector.shape_cast %14 : vector<1x8x32xf32> to vector<8x32xf32>
    %c0_17 = arith.constant 0 : index
    %c0_18 = arith.constant 0 : index
    %c0_19 = arith.constant 0 : index
    %16 = vector.load %arg2[%c0_17, %c0_18, %c0_19] : memref<8x8x128xf32, #tpu.memory_space<vmem>>, vector<1x8x128xf32>
    %17 = vector.shape_cast %16 : vector<1x8x128xf32> to vector<8x128xf32>
    %cst = arith.constant dense<0.000000e+00> : vector<8x128xf32>
    %18 = tpu.matmul %9, %3, %cst {dimension_numbers = #tpu.dot_dimension_numbers<[1], [0], [0], [1], [0, 0, 1, 1], [], []>} : vector<8x32xf32>, vector<32x128xf32>, vector<8x128xf32> -> vector<8x128xf32>
    %19 = arith.addf %17, %18 : vector<8x128xf32>
    %20 = vector.extract_strided_slice %19 {offsets = [0, 0], sizes = [8, 32], strides = [1, 1]} : vector<8x128xf32> to vector<8x32xf32>
    %cst_20 = arith.constant 5.000000e-01 : f32
    %21 = vector.broadcast %cst_20 : f32 to vector<8x32xf32>
    %22 = arith.mulf %21, %20 : vector<8x32xf32>
    %23 = math.tanh %22 : vector<8x32xf32>
    %cst_21 = arith.constant 1.000000e+00 : f32
    %24 = vector.broadcast %cst_21 : f32 to vector<8x32xf32>
    %25 = arith.addf %23, %24 : vector<8x32xf32>
    %cst_22 = arith.constant 5.000000e-01 : f32
    %26 = vector.broadcast %cst_22 : f32 to vector<8x32xf32>
    %27 = arith.mulf %26, %25 : vector<8x32xf32>
    %28 = vector.extract_strided_slice %19 {offsets = [0, 32], sizes = [8, 32], strides = [1, 1]} : vector<8x128xf32> to vector<8x32xf32>
    %cst_23 = arith.constant 5.000000e-01 : f32
    %29 = vector.broadcast %cst_23 : f32 to vector<8x32xf32>
    %30 = arith.mulf %29, %28 : vector<8x32xf32>
    %31 = math.tanh %30 : vector<8x32xf32>
    %cst_24 = arith.constant 1.000000e+00 : f32
    %32 = vector.broadcast %cst_24 : f32 to vector<8x32xf32>
    %33 = arith.addf %31, %32 : vector<8x32xf32>
    %cst_25 = arith.constant 5.000000e-01 : f32
    %34 = vector.broadcast %cst_25 : f32 to vector<8x32xf32>
    %35 = arith.mulf %34, %33 : vector<8x32xf32>
    %36 = vector.extract_strided_slice %19 {offsets = [0, 64], sizes = [8, 32], strides = [1, 1]} : vector<8x128xf32> to vector<8x32xf32>
    %37 = math.tanh %36 : vector<8x32xf32>
    %38 = vector.extract_strided_slice %19 {offsets = [0, 96], sizes = [8, 32], strides = [1, 1]} : vector<8x128xf32> to vector<8x32xf32>
    %cst_26 = arith.constant 5.000000e-01 : f32
    %39 = vector.broadcast %cst_26 : f32 to vector<8x32xf32>
    %40 = arith.mulf %39, %38 : vector<8x32xf32>
    %41 = math.tanh %40 : vector<8x32xf32>
    %cst_27 = arith.constant 1.000000e+00 : f32
    %42 = vector.broadcast %cst_27 : f32 to vector<8x32xf32>
    %43 = arith.addf %41, %42 : vector<8x32xf32>
    %cst_28 = arith.constant 5.000000e-01 : f32
    %44 = vector.broadcast %cst_28 : f32 to vector<8x32xf32>
    %45 = arith.mulf %44, %43 : vector<8x32xf32>
    %46 = arith.mulf %35, %11 : vector<8x32xf32>
    %47 = arith.mulf %27, %37 : vector<8x32xf32>
    %48 = arith.addf %46, %47 : vector<8x32xf32>
    %49 = math.tanh %48 : vector<8x32xf32>
    %50 = arith.mulf %45, %49 : vector<8x32xf32>
    %51 = tpu.concatenate %50, %13 in 1 : vector<8x32xf32>, vector<8x32xf32> -> vector<8x64xf32>
    %cst_29 = arith.constant dense<0.000000e+00> : vector<8x128xf32>
    %52 = tpu.matmul %51, %4, %cst_29 {dimension_numbers = #tpu.dot_dimension_numbers<[1], [0], [0], [1], [0, 0, 1, 1], [], []>} : vector<8x64xf32>, vector<64x128xf32>, vector<8x128xf32> -> vector<8x128xf32>
    %53 = arith.addf %52, %7 : vector<8x128xf32>
    %54 = vector.extract_strided_slice %53 {offsets = [0, 0], sizes = [8, 32], strides = [1, 1]} : vector<8x128xf32> to vector<8x32xf32>
    %cst_30 = arith.constant 5.000000e-01 : f32
    %55 = vector.broadcast %cst_30 : f32 to vector<8x32xf32>
    %56 = arith.mulf %55, %54 : vector<8x32xf32>
    %57 = math.tanh %56 : vector<8x32xf32>
    %cst_31 = arith.constant 1.000000e+00 : f32
    %58 = vector.broadcast %cst_31 : f32 to vector<8x32xf32>
    %59 = arith.addf %57, %58 : vector<8x32xf32>
    %cst_32 = arith.constant 5.000000e-01 : f32
    %60 = vector.broadcast %cst_32 : f32 to vector<8x32xf32>
    %61 = arith.mulf %60, %59 : vector<8x32xf32>
    %62 = vector.extract_strided_slice %53 {offsets = [0, 32], sizes = [8, 32], strides = [1, 1]} : vector<8x128xf32> to vector<8x32xf32>
    %cst_33 = arith.constant 5.000000e-01 : f32
    %63 = vector.broadcast %cst_33 : f32 to vector<8x32xf32>
    %64 = arith.mulf %63, %62 : vector<8x32xf32>
    %65 = math.tanh %64 : vector<8x32xf32>
    %cst_34 = arith.constant 1.000000e+00 : f32
    %66 = vector.broadcast %cst_34 : f32 to vector<8x32xf32>
    %67 = arith.addf %65, %66 : vector<8x32xf32>
    %cst_35 = arith.constant 5.000000e-01 : f32
    %68 = vector.broadcast %cst_35 : f32 to vector<8x32xf32>
    %69 = arith.mulf %68, %67 : vector<8x32xf32>
    %70 = vector.extract_strided_slice %53 {offsets = [0, 64], sizes = [8, 32], strides = [1, 1]} : vector<8x128xf32> to vector<8x32xf32>
    %71 = math.tanh %70 : vector<8x32xf32>
    %72 = vector.extract_strided_slice %53 {offsets = [0, 96], sizes = [8, 32], strides = [1, 1]} : vector<8x128xf32> to vector<8x32xf32>
    %cst_36 = arith.constant 5.000000e-01 : f32
    %73 = vector.broadcast %cst_36 : f32 to vector<8x32xf32>
    %74 = arith.mulf %73, %72 : vector<8x32xf32>
    %75 = math.tanh %74 : vector<8x32xf32>
    %cst_37 = arith.constant 1.000000e+00 : f32
    %76 = vector.broadcast %cst_37 : f32 to vector<8x32xf32>
    %77 = arith.addf %75, %76 : vector<8x32xf32>
    %cst_38 = arith.constant 5.000000e-01 : f32
    %78 = vector.broadcast %cst_38 : f32 to vector<8x32xf32>
    %79 = arith.mulf %78, %77 : vector<8x32xf32>
    %80 = arith.mulf %69, %15 : vector<8x32xf32>
    %81 = arith.mulf %61, %71 : vector<8x32xf32>
    %82 = arith.addf %80, %81 : vector<8x32xf32>
    %83 = math.tanh %82 : vector<8x32xf32>
    %84 = arith.mulf %79, %83 : vector<8x32xf32>
    %c0_39 = arith.constant 0 : index
    %c0_40 = arith.constant 0 : index
    %c0_41 = arith.constant 0 : index
    %85 = vector.load %arg6[%c0_39, %c0_40, %c0_41] : memref<8x8x32xf32, #tpu.memory_space<vmem>>, vector<1x8x32xf32>
    %86 = vector.shape_cast %85 : vector<1x8x32xf32> to vector<8x32xf32>
    %87 = vector.shape_cast %84 : vector<8x32xf32> to vector<1x8x32xf32>
    tpu.vector_store %arg6[%c0_39, %c0_40, %c0_41], %87 {strides = array<i32>} : memref<8x8x32xf32, #tpu.memory_space<vmem>>, vector<1x8x32xf32>,
    %c1_42 = arith.constant 1 : index
    %c0_43 = arith.constant 0 : index
    %c0_44 = arith.constant 0 : index
    %88 = vector.load %arg2[%c1_42, %c0_43, %c0_44] : memref<8x8x128xf32, #tpu.memory_space<vmem>>, vector<1x8x128xf32>
    %89 = vector.shape_cast %88 : vector<1x8x128xf32> to vector<8x128xf32>
    %cst_45 = arith.constant dense<0.000000e+00> : vector<8x128xf32>
    %90 = tpu.matmul %50, %3, %cst_45 {dimension_numbers = #tpu.dot_dimension_numbers<[1], [0], [0], [1], [0, 0, 1, 1], [], []>} : vector<8x32xf32>, vector<32x128xf32>, vector<8x128xf32> -> vector<8x128xf32>
    %91 = arith.addf %89, %90 : vector<8x128xf32>
    %92 = vector.extract_strided_slice %91 {offsets = [0, 0], sizes = [8, 32], strides = [1, 1]} : vector<8x128xf32> to vector<8x32xf32>
    %cst_46 = arith.constant 5.000000e-01 : f32
    %93 = vector.broadcast %cst_46 : f32 to vector<8x32xf32>
    %94 = arith.mulf %93, %92 : vector<8x32xf32>
    %95 = math.tanh %94 : vector<8x32xf32>
    %cst_47 = arith.constant 1.000000e+00 : f32
    %96 = vector.broadcast %cst_47 : f32 to vector<8x32xf32>
    %97 = arith.addf %95, %96 : vector<8x32xf32>
    %cst_48 = arith.constant 5.000000e-01 : f32
    %98 = vector.broadcast %cst_48 : f32 to vector<8x32xf32>
    %99 = arith.mulf %98, %97 : vector<8x32xf32>
    %100 = vector.extract_strided_slice %91 {offsets = [0, 32], sizes = [8, 32], strides = [1, 1]} : vector<8x128xf32> to vector<8x32xf32>
    %cst_49 = arith.constant 5.000000e-01 : f32
    %101 = vector.broadcast %cst_49 : f32 to vector<8x32xf32>
    %102 = arith.mulf %101, %100 : vector<8x32xf32>
    %103 = math.tanh %102 : vector<8x32xf32>
    %cst_50 = arith.constant 1.000000e+00 : f32
    %104 = vector.broadcast %cst_50 : f32 to vector<8x32xf32>
    %105 = arith.addf %103, %104 : vector<8x32xf32>
    %cst_51 = arith.constant 5.000000e-01 : f32
    %106 = vector.broadcast %cst_51 : f32 to vector<8x32xf32>
    %107 = arith.mulf %106, %105 : vector<8x32xf32>
    %108 = vector.extract_strided_slice %91 {offsets = [0, 64], sizes = [8, 32], strides = [1, 1]} : vector<8x128xf32> to vector<8x32xf32>
    %109 = math.tanh %108 : vector<8x32xf32>
    %110 = vector.extract_strided_slice %91 {offsets = [0, 96], sizes = [8, 32], strides = [1, 1]} : vector<8x128xf32> to vector<8x32xf32>
    %cst_52 = arith.constant 5.000000e-01 : f32
    %111 = vector.broadcast %cst_52 : f32 to vector<8x32xf32>
    %112 = arith.mulf %111, %110 : vector<8x32xf32>
    %113 = math.tanh %112 : vector<8x32xf32>
    %cst_53 = arith.constant 1.000000e+00 : f32
    %114 = vector.broadcast %cst_53 : f32 to vector<8x32xf32>
    %115 = arith.addf %113, %114 : vector<8x32xf32>
    %cst_54 = arith.constant 5.000000e-01 : f32
    %116 = vector.broadcast %cst_54 : f32 to vector<8x32xf32>
    %117 = arith.mulf %116, %115 : vector<8x32xf32>
    %118 = arith.mulf %107, %48 : vector<8x32xf32>
    %119 = arith.mulf %99, %109 : vector<8x32xf32>
    %120 = arith.addf %118, %119 : vector<8x32xf32>
    %121 = math.tanh %120 : vector<8x32xf32>
    %122 = arith.mulf %117, %121 : vector<8x32xf32>
    %123 = tpu.concatenate %122, %84 in 1 : vector<8x32xf32>, vector<8x32xf32> -> vector<8x64xf32>
    %cst_55 = arith.constant dense<0.000000e+00> : vector<8x128xf32>
    %124 = tpu.matmul %123, %4, %cst_55 {dimension_numbers = #tpu.dot_dimension_numbers<[1], [0], [0], [1], [0, 0, 1, 1], [], []>} : vector<8x64xf32>, vector<64x128xf32>, vector<8x128xf32> -> vector<8x128xf32>
    %125 = arith.addf %124, %7 : vector<8x128xf32>
    %126 = vector.extract_strided_slice %125 {offsets = [0, 0], sizes = [8, 32], strides = [1, 1]} : vector<8x128xf32> to vector<8x32xf32>
    %cst_56 = arith.constant 5.000000e-01 : f32
    %127 = vector.broadcast %cst_56 : f32 to vector<8x32xf32>
    %128 = arith.mulf %127, %126 : vector<8x32xf32>
    %129 = math.tanh %128 : vector<8x32xf32>
    %cst_57 = arith.constant 1.000000e+00 : f32
    %130 = vector.broadcast %cst_57 : f32 to vector<8x32xf32>
    %131 = arith.addf %129, %130 : vector<8x32xf32>
    %cst_58 = arith.constant 5.000000e-01 : f32
    %132 = vector.broadcast %cst_58 : f32 to vector<8x32xf32>
    %133 = arith.mulf %132, %131 : vector<8x32xf32>
    %134 = vector.extract_strided_slice %125 {offsets = [0, 32], sizes = [8, 32], strides = [1, 1]} : vector<8x128xf32> to vector<8x32xf32>
    %cst_59 = arith.constant 5.000000e-01 : f32
    %135 = vector.broadcast %cst_59 : f32 to vector<8x32xf32>
    %136 = arith.mulf %135, %134 : vector<8x32xf32>
    %137 = math.tanh %136 : vector<8x32xf32>
    %cst_60 = arith.constant 1.000000e+00 : f32
    %138 = vector.broadcast %cst_60 : f32 to vector<8x32xf32>
    %139 = arith.addf %137, %138 : vector<8x32xf32>
    %cst_61 = arith.constant 5.000000e-01 : f32
    %140 = vector.broadcast %cst_61 : f32 to vector<8x32xf32>
    %141 = arith.mulf %140, %139 : vector<8x32xf32>
    %142 = vector.extract_strided_slice %125 {offsets = [0, 64], sizes = [8, 32], strides = [1, 1]} : vector<8x128xf32> to vector<8x32xf32>
    %143 = math.tanh %142 : vector<8x32xf32>
    %144 = vector.extract_strided_slice %125 {offsets = [0, 96], sizes = [8, 32], strides = [1, 1]} : vector<8x128xf32> to vector<8x32xf32>
    %cst_62 = arith.constant 5.000000e-01 : f32
    %145 = vector.broadcast %cst_62 : f32 to vector<8x32xf32>
    %146 = arith.mulf %145, %144 : vector<8x32xf32>
    %147 = math.tanh %146 : vector<8x32xf32>
    %cst_63 = arith.constant 1.000000e+00 : f32
    %148 = vector.broadcast %cst_63 : f32 to vector<8x32xf32>
    %149 = arith.addf %147, %148 : vector<8x32xf32>
    %cst_64 = arith.constant 5.000000e-01 : f32
    %150 = vector.broadcast %cst_64 : f32 to vector<8x32xf32>
    %151 = arith.mulf %150, %149 : vector<8x32xf32>
    %152 = arith.mulf %141, %82 : vector<8x32xf32>
    %153 = arith.mulf %133, %143 : vector<8x32xf32>
    %154 = arith.addf %152, %153 : vector<8x32xf32>
    %155 = math.tanh %154 : vector<8x32xf32>
    %156 = arith.mulf %151, %155 : vector<8x32xf32>
    %c1_65 = arith.constant 1 : index
    %c0_66 = arith.constant 0 : index
    %c0_67 = arith.constant 0 : index
    %157 = vector.load %arg6[%c1_65, %c0_66, %c0_67] : memref<8x8x32xf32, #tpu.memory_space<vmem>>, vector<1x8x32xf32>
    %158 = vector.shape_cast %157 : vector<1x8x32xf32> to vector<8x32xf32>
    %159 = vector.shape_cast %156 : vector<8x32xf32> to vector<1x8x32xf32>
    tpu.vector_store %arg6[%c1_65, %c0_66, %c0_67], %159 {strides = array<i32>} : memref<8x8x32xf32, #tpu.memory_space<vmem>>, vector<1x8x32xf32>,
    %c2 = arith.constant 2 : index
    %c0_68 = arith.constant 0 : index
    %c0_69 = arith.constant 0 : index
    %160 = vector.load %arg2[%c2, %c0_68, %c0_69] : memref<8x8x128xf32, #tpu.memory_space<vmem>>, vector<1x8x128xf32>
    %161 = vector.shape_cast %160 : vector<1x8x128xf32> to vector<8x128xf32>
    %cst_70 = arith.constant dense<0.000000e+00> : vector<8x128xf32>
    %162 = tpu.matmul %122, %3, %cst_70 {dimension_numbers = #tpu.dot_dimension_numbers<[1], [0], [0], [1], [0, 0, 1, 1], [], []>} : vector<8x32xf32>, vector<32x128xf32>, vector<8x128xf32> -> vector<8x128xf32>
    %163 = arith.addf %161, %162 : vector<8x128xf32>
    %164 = vector.extract_strided_slice %163 {offsets = [0, 0], sizes = [8, 32], strides = [1, 1]} : vector<8x128xf32> to vector<8x32xf32>
    %cst_71 = arith.constant 5.000000e-01 : f32
    %165 = vector.broadcast %cst_71 : f32 to vector<8x32xf32>
    %166 = arith.mulf %165, %164 : vector<8x32xf32>
    %167 = math.tanh %166 : vector<8x32xf32>
    %cst_72 = arith.constant 1.000000e+00 : f32
    %168 = vector.broadcast %cst_72 : f32 to vector<8x32xf32>
    %169 = arith.addf %167, %168 : vector<8x32xf32>
    %cst_73 = arith.constant 5.000000e-01 : f32
    %170 = vector.broadcast %cst_73 : f32 to vector<8x32xf32>
    %171 = arith.mulf %170, %169 : vector<8x32xf32>
    %172 = vector.extract_strided_slice %163 {offsets = [0, 32], sizes = [8, 32], strides = [1, 1]} : vector<8x128xf32> to vector<8x32xf32>
    %cst_74 = arith.constant 5.000000e-01 : f32
    %173 = vector.broadcast %cst_74 : f32 to vector<8x32xf32>
    %174 = arith.mulf %173, %172 : vector<8x32xf32>
    %175 = math.tanh %174 : vector<8x32xf32>
    %cst_75 = arith.constant 1.000000e+00 : f32
    %176 = vector.broadcast %cst_75 : f32 to vector<8x32xf32>
    %177 = arith.addf %175, %176 : vector<8x32xf32>
    %cst_76 = arith.constant 5.000000e-01 : f32
    %178 = vector.broadcast %cst_76 : f32 to vector<8x32xf32>
    %179 = arith.mulf %178, %177 : vector<8x32xf32>
    %180 = vector.extract_strided_slice %163 {offsets = [0, 64], sizes = [8, 32], strides = [1, 1]} : vector<8x128xf32> to vector<8x32xf32>
    %181 = math.tanh %180 : vector<8x32xf32>
    %182 = vector.extract_strided_slice %163 {offsets = [0, 96], sizes = [8, 32], strides = [1, 1]} : vector<8x128xf32> to vector<8x32xf32>
    %cst_77 = arith.constant 5.000000e-01 : f32
    %183 = vector.broadcast %cst_77 : f32 to vector<8x32xf32>
    %184 = arith.mulf %183, %182 : vector<8x32xf32>
    %185 = math.tanh %184 : vector<8x32xf32>
    %cst_78 = arith.constant 1.000000e+00 : f32
    %186 = vector.broadcast %cst_78 : f32 to vector<8x32xf32>
    %187 = arith.addf %185, %186 : vector<8x32xf32>
    %cst_79 = arith.constant 5.000000e-01 : f32
    %188 = vector.broadcast %cst_79 : f32 to vector<8x32xf32>
    %189 = arith.mulf %188, %187 : vector<8x32xf32>
    %190 = arith.mulf %179, %120 : vector<8x32xf32>
    %191 = arith.mulf %171, %181 : vector<8x32xf32>
    %192 = arith.addf %190, %191 : vector<8x32xf32>
    %193 = math.tanh %192 : vector<8x32xf32>
    %194 = arith.mulf %189, %193 : vector<8x32xf32>
    %195 = tpu.concatenate %194, %156 in 1 : vector<8x32xf32>, vector<8x32xf32> -> vector<8x64xf32>
    %cst_80 = arith.constant dense<0.000000e+00> : vector<8x128xf32>
    %196 = tpu.matmul %195, %4, %cst_80 {dimension_numbers = #tpu.dot_dimension_numbers<[1], [0], [0], [1], [0, 0, 1, 1], [], []>} : vector<8x64xf32>, vector<64x128xf32>, vector<8x128xf32> -> vector<8x128xf32>
    %197 = arith.addf %196, %7 : vector<8x128xf32>
    %198 = vector.extract_strided_slice %197 {offsets = [0, 0], sizes = [8, 32], strides = [1, 1]} : vector<8x128xf32> to vector<8x32xf32>
    %cst_81 = arith.constant 5.000000e-01 : f32
    %199 = vector.broadcast %cst_81 : f32 to vector<8x32xf32>
    %200 = arith.mulf %199, %198 : vector<8x32xf32>
    %201 = math.tanh %200 : vector<8x32xf32>
    %cst_82 = arith.constant 1.000000e+00 : f32
    %202 = vector.broadcast %cst_82 : f32 to vector<8x32xf32>
    %203 = arith.addf %201, %202 : vector<8x32xf32>
    %cst_83 = arith.constant 5.000000e-01 : f32
    %204 = vector.broadcast %cst_83 : f32 to vector<8x32xf32>
    %205 = arith.mulf %204, %203 : vector<8x32xf32>
    %206 = vector.extract_strided_slice %197 {offsets = [0, 32], sizes = [8, 32], strides = [1, 1]} : vector<8x128xf32> to vector<8x32xf32>
    %cst_84 = arith.constant 5.000000e-01 : f32
    %207 = vector.broadcast %cst_84 : f32 to vector<8x32xf32>
    %208 = arith.mulf %207, %206 : vector<8x32xf32>
    %209 = math.tanh %208 : vector<8x32xf32>
    %cst_85 = arith.constant 1.000000e+00 : f32
    %210 = vector.broadcast %cst_85 : f32 to vector<8x32xf32>
    %211 = arith.addf %209, %210 : vector<8x32xf32>
    %cst_86 = arith.constant 5.000000e-01 : f32
    %212 = vector.broadcast %cst_86 : f32 to vector<8x32xf32>
    %213 = arith.mulf %212, %211 : vector<8x32xf32>
    %214 = vector.extract_strided_slice %197 {offsets = [0, 64], sizes = [8, 32], strides = [1, 1]} : vector<8x128xf32> to vector<8x32xf32>
    %215 = math.tanh %214 : vector<8x32xf32>
    %216 = vector.extract_strided_slice %197 {offsets = [0, 96], sizes = [8, 32], strides = [1, 1]} : vector<8x128xf32> to vector<8x32xf32>
    %cst_87 = arith.constant 5.000000e-01 : f32
    %217 = vector.broadcast %cst_87 : f32 to vector<8x32xf32>
    %218 = arith.mulf %217, %216 : vector<8x32xf32>
    %219 = math.tanh %218 : vector<8x32xf32>
    %cst_88 = arith.constant 1.000000e+00 : f32
    %220 = vector.broadcast %cst_88 : f32 to vector<8x32xf32>
    %221 = arith.addf %219, %220 : vector<8x32xf32>
    %cst_89 = arith.constant 5.000000e-01 : f32
    %222 = vector.broadcast %cst_89 : f32 to vector<8x32xf32>
    %223 = arith.mulf %222, %221 : vector<8x32xf32>
    %224 = arith.mulf %213, %154 : vector<8x32xf32>
    %225 = arith.mulf %205, %215 : vector<8x32xf32>
    %226 = arith.addf %224, %225 : vector<8x32xf32>
    %227 = math.tanh %226 : vector<8x32xf32>
    %228 = arith.mulf %223, %227 : vector<8x32xf32>
    %c2_90 = arith.constant 2 : index
    %c0_91 = arith.constant 0 : index
    %c0_92 = arith.constant 0 : index
    %229 = vector.load %arg6[%c2_90, %c0_91, %c0_92] : memref<8x8x32xf32, #tpu.memory_space<vmem>>, vector<1x8x32xf32>
    %230 = vector.shape_cast %229 : vector<1x8x32xf32> to vector<8x32xf32>
    %231 = vector.shape_cast %228 : vector<8x32xf32> to vector<1x8x32xf32>
    tpu.vector_store %arg6[%c2_90, %c0_91, %c0_92], %231 {strides = array<i32>} : memref<8x8x32xf32, #tpu.memory_space<vmem>>, vector<1x8x32xf32>,
    %c3 = arith.constant 3 : index
    %c0_93 = arith.constant 0 : index
    %c0_94 = arith.constant 0 : index
    %232 = vector.load %arg2[%c3, %c0_93, %c0_94] : memref<8x8x128xf32, #tpu.memory_space<vmem>>, vector<1x8x128xf32>
    %233 = vector.shape_cast %232 : vector<1x8x128xf32> to vector<8x128xf32>
    %cst_95 = arith.constant dense<0.000000e+00> : vector<8x128xf32>
    %234 = tpu.matmul %194, %3, %cst_95 {dimension_numbers = #tpu.dot_dimension_numbers<[1], [0], [0], [1], [0, 0, 1, 1], [], []>} : vector<8x32xf32>, vector<32x128xf32>, vector<8x128xf32> -> vector<8x128xf32>
    %235 = arith.addf %233, %234 : vector<8x128xf32>
    %236 = vector.extract_strided_slice %235 {offsets = [0, 0], sizes = [8, 32], strides = [1, 1]} : vector<8x128xf32> to vector<8x32xf32>
    %cst_96 = arith.constant 5.000000e-01 : f32
    %237 = vector.broadcast %cst_96 : f32 to vector<8x32xf32>
    %238 = arith.mulf %237, %236 : vector<8x32xf32>
    %239 = math.tanh %238 : vector<8x32xf32>
    %cst_97 = arith.constant 1.000000e+00 : f32
    %240 = vector.broadcast %cst_97 : f32 to vector<8x32xf32>
    %241 = arith.addf %239, %240 : vector<8x32xf32>
    %cst_98 = arith.constant 5.000000e-01 : f32
    %242 = vector.broadcast %cst_98 : f32 to vector<8x32xf32>
    %243 = arith.mulf %242, %241 : vector<8x32xf32>
    %244 = vector.extract_strided_slice %235 {offsets = [0, 32], sizes = [8, 32], strides = [1, 1]} : vector<8x128xf32> to vector<8x32xf32>
    %cst_99 = arith.constant 5.000000e-01 : f32
    %245 = vector.broadcast %cst_99 : f32 to vector<8x32xf32>
    %246 = arith.mulf %245, %244 : vector<8x32xf32>
    %247 = math.tanh %246 : vector<8x32xf32>
    %cst_100 = arith.constant 1.000000e+00 : f32
    %248 = vector.broadcast %cst_100 : f32 to vector<8x32xf32>
    %249 = arith.addf %247, %248 : vector<8x32xf32>
    %cst_101 = arith.constant 5.000000e-01 : f32
    %250 = vector.broadcast %cst_101 : f32 to vector<8x32xf32>
    %251 = arith.mulf %250, %249 : vector<8x32xf32>
    %252 = vector.extract_strided_slice %235 {offsets = [0, 64], sizes = [8, 32], strides = [1, 1]} : vector<8x128xf32> to vector<8x32xf32>
    %253 = math.tanh %252 : vector<8x32xf32>
    %254 = vector.extract_strided_slice %235 {offsets = [0, 96], sizes = [8, 32], strides = [1, 1]} : vector<8x128xf32> to vector<8x32xf32>
    %cst_102 = arith.constant 5.000000e-01 : f32
    %255 = vector.broadcast %cst_102 : f32 to vector<8x32xf32>
    %256 = arith.mulf %255, %254 : vector<8x32xf32>
    %257 = math.tanh %256 : vector<8x32xf32>
    %cst_103 = arith.constant 1.000000e+00 : f32
    %258 = vector.broadcast %cst_103 : f32 to vector<8x32xf32>
    %259 = arith.addf %257, %258 : vector<8x32xf32>
    %cst_104 = arith.constant 5.000000e-01 : f32
    %260 = vector.broadcast %cst_104 : f32 to vector<8x32xf32>
    %261 = arith.mulf %260, %259 : vector<8x32xf32>
    %262 = arith.mulf %251, %192 : vector<8x32xf32>
    %263 = arith.mulf %243, %253 : vector<8x32xf32>
    %264 = arith.addf %262, %263 : vector<8x32xf32>
    %265 = math.tanh %264 : vector<8x32xf32>
    %266 = arith.mulf %261, %265 : vector<8x32xf32>
    %267 = tpu.concatenate %266, %228 in 1 : vector<8x32xf32>, vector<8x32xf32> -> vector<8x64xf32>
    %cst_105 = arith.constant dense<0.000000e+00> : vector<8x128xf32>
    %268 = tpu.matmul %267, %4, %cst_105 {dimension_numbers = #tpu.dot_dimension_numbers<[1], [0], [0], [1], [0, 0, 1, 1], [], []>} : vector<8x64xf32>, vector<64x128xf32>, vector<8x128xf32> -> vector<8x128xf32>
    %269 = arith.addf %268, %7 : vector<8x128xf32>
    %270 = vector.extract_strided_slice %269 {offsets = [0, 0], sizes = [8, 32], strides = [1, 1]} : vector<8x128xf32> to vector<8x32xf32>
    %cst_106 = arith.constant 5.000000e-01 : f32
    %271 = vector.broadcast %cst_106 : f32 to vector<8x32xf32>
    %272 = arith.mulf %271, %270 : vector<8x32xf32>
    %273 = math.tanh %272 : vector<8x32xf32>
    %cst_107 = arith.constant 1.000000e+00 : f32
    %274 = vector.broadcast %cst_107 : f32 to vector<8x32xf32>
    %275 = arith.addf %273, %274 : vector<8x32xf32>
    %cst_108 = arith.constant 5.000000e-01 : f32
    %276 = vector.broadcast %cst_108 : f32 to vector<8x32xf32>
    %277 = arith.mulf %276, %275 : vector<8x32xf32>
    %278 = vector.extract_strided_slice %269 {offsets = [0, 32], sizes = [8, 32], strides = [1, 1]} : vector<8x128xf32> to vector<8x32xf32>
    %cst_109 = arith.constant 5.000000e-01 : f32
    %279 = vector.broadcast %cst_109 : f32 to vector<8x32xf32>
    %280 = arith.mulf %279, %278 : vector<8x32xf32>
    %281 = math.tanh %280 : vector<8x32xf32>
    %cst_110 = arith.constant 1.000000e+00 : f32
    %282 = vector.broadcast %cst_110 : f32 to vector<8x32xf32>
    %283 = arith.addf %281, %282 : vector<8x32xf32>
    %cst_111 = arith.constant 5.000000e-01 : f32
    %284 = vector.broadcast %cst_111 : f32 to vector<8x32xf32>
    %285 = arith.mulf %284, %283 : vector<8x32xf32>
    %286 = vector.extract_strided_slice %269 {offsets = [0, 64], sizes = [8, 32], strides = [1, 1]} : vector<8x128xf32> to vector<8x32xf32>
    %287 = math.tanh %286 : vector<8x32xf32>
    %288 = vector.extract_strided_slice %269 {offsets = [0, 96], sizes = [8, 32], strides = [1, 1]} : vector<8x128xf32> to vector<8x32xf32>
    %cst_112 = arith.constant 5.000000e-01 : f32
    %289 = vector.broadcast %cst_112 : f32 to vector<8x32xf32>
    %290 = arith.mulf %289, %288 : vector<8x32xf32>
    %291 = math.tanh %290 : vector<8x32xf32>
    %cst_113 = arith.constant 1.000000e+00 : f32
    %292 = vector.broadcast %cst_113 : f32 to vector<8x32xf32>
    %293 = arith.addf %291, %292 : vector<8x32xf32>
    %cst_114 = arith.constant 5.000000e-01 : f32
    %294 = vector.broadcast %cst_114 : f32 to vector<8x32xf32>
    %295 = arith.mulf %294, %293 : vector<8x32xf32>
    %296 = arith.mulf %285, %226 : vector<8x32xf32>
    %297 = arith.mulf %277, %287 : vector<8x32xf32>
    %298 = arith.addf %296, %297 : vector<8x32xf32>
    %299 = math.tanh %298 : vector<8x32xf32>
    %300 = arith.mulf %295, %299 : vector<8x32xf32>
    %c3_115 = arith.constant 3 : index
    %c0_116 = arith.constant 0 : index
    %c0_117 = arith.constant 0 : index
    %301 = vector.load %arg6[%c3_115, %c0_116, %c0_117] : memref<8x8x32xf32, #tpu.memory_space<vmem>>, vector<1x8x32xf32>
    %302 = vector.shape_cast %301 : vector<1x8x32xf32> to vector<8x32xf32>
    %303 = vector.shape_cast %300 : vector<8x32xf32> to vector<1x8x32xf32>
    tpu.vector_store %arg6[%c3_115, %c0_116, %c0_117], %303 {strides = array<i32>} : memref<8x8x32xf32, #tpu.memory_space<vmem>>, vector<1x8x32xf32>,
    %c4 = arith.constant 4 : index
    %c0_118 = arith.constant 0 : index
    %c0_119 = arith.constant 0 : index
    %304 = vector.load %arg2[%c4, %c0_118, %c0_119] : memref<8x8x128xf32, #tpu.memory_space<vmem>>, vector<1x8x128xf32>
    %305 = vector.shape_cast %304 : vector<1x8x128xf32> to vector<8x128xf32>
    %cst_120 = arith.constant dense<0.000000e+00> : vector<8x128xf32>
    %306 = tpu.matmul %266, %3, %cst_120 {dimension_numbers = #tpu.dot_dimension_numbers<[1], [0], [0], [1], [0, 0, 1, 1], [], []>} : vector<8x32xf32>, vector<32x128xf32>, vector<8x128xf32> -> vector<8x128xf32>
    %307 = arith.addf %305, %306 : vector<8x128xf32>
    %308 = vector.extract_strided_slice %307 {offsets = [0, 0], sizes = [8, 32], strides = [1, 1]} : vector<8x128xf32> to vector<8x32xf32>
    %cst_121 = arith.constant 5.000000e-01 : f32
    %309 = vector.broadcast %cst_121 : f32 to vector<8x32xf32>
    %310 = arith.mulf %309, %308 : vector<8x32xf32>
    %311 = math.tanh %310 : vector<8x32xf32>
    %cst_122 = arith.constant 1.000000e+00 : f32
    %312 = vector.broadcast %cst_122 : f32 to vector<8x32xf32>
    %313 = arith.addf %311, %312 : vector<8x32xf32>
    %cst_123 = arith.constant 5.000000e-01 : f32
    %314 = vector.broadcast %cst_123 : f32 to vector<8x32xf32>
    %315 = arith.mulf %314, %313 : vector<8x32xf32>
    %316 = vector.extract_strided_slice %307 {offsets = [0, 32], sizes = [8, 32], strides = [1, 1]} : vector<8x128xf32> to vector<8x32xf32>
    %cst_124 = arith.constant 5.000000e-01 : f32
    %317 = vector.broadcast %cst_124 : f32 to vector<8x32xf32>
    %318 = arith.mulf %317, %316 : vector<8x32xf32>
    %319 = math.tanh %318 : vector<8x32xf32>
    %cst_125 = arith.constant 1.000000e+00 : f32
    %320 = vector.broadcast %cst_125 : f32 to vector<8x32xf32>
    %321 = arith.addf %319, %320 : vector<8x32xf32>
    %cst_126 = arith.constant 5.000000e-01 : f32
    %322 = vector.broadcast %cst_126 : f32 to vector<8x32xf32>
    %323 = arith.mulf %322, %321 : vector<8x32xf32>
    %324 = vector.extract_strided_slice %307 {offsets = [0, 64], sizes = [8, 32], strides = [1, 1]} : vector<8x128xf32> to vector<8x32xf32>
    %325 = math.tanh %324 : vector<8x32xf32>
    %326 = vector.extract_strided_slice %307 {offsets = [0, 96], sizes = [8, 32], strides = [1, 1]} : vector<8x128xf32> to vector<8x32xf32>
    %cst_127 = arith.constant 5.000000e-01 : f32
    %327 = vector.broadcast %cst_127 : f32 to vector<8x32xf32>
    %328 = arith.mulf %327, %326 : vector<8x32xf32>
    %329 = math.tanh %328 : vector<8x32xf32>
    %cst_128 = arith.constant 1.000000e+00 : f32
    %330 = vector.broadcast %cst_128 : f32 to vector<8x32xf32>
    %331 = arith.addf %329, %330 : vector<8x32xf32>
    %cst_129 = arith.constant 5.000000e-01 : f32
    %332 = vector.broadcast %cst_129 : f32 to vector<8x32xf32>
    %333 = arith.mulf %332, %331 : vector<8x32xf32>
    %334 = arith.mulf %323, %264 : vector<8x32xf32>
    %335 = arith.mulf %315, %325 : vector<8x32xf32>
    %336 = arith.addf %334, %335 : vector<8x32xf32>
    %337 = math.tanh %336 : vector<8x32xf32>
    %338 = arith.mulf %333, %337 : vector<8x32xf32>
    %339 = tpu.concatenate %338, %300 in 1 : vector<8x32xf32>, vector<8x32xf32> -> vector<8x64xf32>
    %cst_130 = arith.constant dense<0.000000e+00> : vector<8x128xf32>
    %340 = tpu.matmul %339, %4, %cst_130 {dimension_numbers = #tpu.dot_dimension_numbers<[1], [0], [0], [1], [0, 0, 1, 1], [], []>} : vector<8x64xf32>, vector<64x128xf32>, vector<8x128xf32> -> vector<8x128xf32>
    %341 = arith.addf %340, %7 : vector<8x128xf32>
    %342 = vector.extract_strided_slice %341 {offsets = [0, 0], sizes = [8, 32], strides = [1, 1]} : vector<8x128xf32> to vector<8x32xf32>
    %cst_131 = arith.constant 5.000000e-01 : f32
    %343 = vector.broadcast %cst_131 : f32 to vector<8x32xf32>
    %344 = arith.mulf %343, %342 : vector<8x32xf32>
    %345 = math.tanh %344 : vector<8x32xf32>
    %cst_132 = arith.constant 1.000000e+00 : f32
    %346 = vector.broadcast %cst_132 : f32 to vector<8x32xf32>
    %347 = arith.addf %345, %346 : vector<8x32xf32>
    %cst_133 = arith.constant 5.000000e-01 : f32
    %348 = vector.broadcast %cst_133 : f32 to vector<8x32xf32>
    %349 = arith.mulf %348, %347 : vector<8x32xf32>
    %350 = vector.extract_strided_slice %341 {offsets = [0, 32], sizes = [8, 32], strides = [1, 1]} : vector<8x128xf32> to vector<8x32xf32>
    %cst_134 = arith.constant 5.000000e-01 : f32
    %351 = vector.broadcast %cst_134 : f32 to vector<8x32xf32>
    %352 = arith.mulf %351, %350 : vector<8x32xf32>
    %353 = math.tanh %352 : vector<8x32xf32>
    %cst_135 = arith.constant 1.000000e+00 : f32
    %354 = vector.broadcast %cst_135 : f32 to vector<8x32xf32>
    %355 = arith.addf %353, %354 : vector<8x32xf32>
    %cst_136 = arith.constant 5.000000e-01 : f32
    %356 = vector.broadcast %cst_136 : f32 to vector<8x32xf32>
    %357 = arith.mulf %356, %355 : vector<8x32xf32>
    %358 = vector.extract_strided_slice %341 {offsets = [0, 64], sizes = [8, 32], strides = [1, 1]} : vector<8x128xf32> to vector<8x32xf32>
    %359 = math.tanh %358 : vector<8x32xf32>
    %360 = vector.extract_strided_slice %341 {offsets = [0, 96], sizes = [8, 32], strides = [1, 1]} : vector<8x128xf32> to vector<8x32xf32>
    %cst_137 = arith.constant 5.000000e-01 : f32
    %361 = vector.broadcast %cst_137 : f32 to vector<8x32xf32>
    %362 = arith.mulf %361, %360 : vector<8x32xf32>
    %363 = math.tanh %362 : vector<8x32xf32>
    %cst_138 = arith.constant 1.000000e+00 : f32
    %364 = vector.broadcast %cst_138 : f32 to vector<8x32xf32>
    %365 = arith.addf %363, %364 : vector<8x32xf32>
    %cst_139 = arith.constant 5.000000e-01 : f32
    %366 = vector.broadcast %cst_139 : f32 to vector<8x32xf32>
    %367 = arith.mulf %366, %365 : vector<8x32xf32>
    %368 = arith.mulf %357, %298 : vector<8x32xf32>
    %369 = arith.mulf %349, %359 : vector<8x32xf32>
    %370 = arith.addf %368, %369 : vector<8x32xf32>
    %371 = math.tanh %370 : vector<8x32xf32>
    %372 = arith.mulf %367, %371 : vector<8x32xf32>
    %c4_140 = arith.constant 4 : index
    %c0_141 = arith.constant 0 : index
    %c0_142 = arith.constant 0 : index
    %373 = vector.load %arg6[%c4_140, %c0_141, %c0_142] : memref<8x8x32xf32, #tpu.memory_space<vmem>>, vector<1x8x32xf32>
    %374 = vector.shape_cast %373 : vector<1x8x32xf32> to vector<8x32xf32>
    %375 = vector.shape_cast %372 : vector<8x32xf32> to vector<1x8x32xf32>
    tpu.vector_store %arg6[%c4_140, %c0_141, %c0_142], %375 {strides = array<i32>} : memref<8x8x32xf32, #tpu.memory_space<vmem>>, vector<1x8x32xf32>,
    %c5 = arith.constant 5 : index
    %c0_143 = arith.constant 0 : index
    %c0_144 = arith.constant 0 : index
    %376 = vector.load %arg2[%c5, %c0_143, %c0_144] : memref<8x8x128xf32, #tpu.memory_space<vmem>>, vector<1x8x128xf32>
    %377 = vector.shape_cast %376 : vector<1x8x128xf32> to vector<8x128xf32>
    %cst_145 = arith.constant dense<0.000000e+00> : vector<8x128xf32>
    %378 = tpu.matmul %338, %3, %cst_145 {dimension_numbers = #tpu.dot_dimension_numbers<[1], [0], [0], [1], [0, 0, 1, 1], [], []>} : vector<8x32xf32>, vector<32x128xf32>, vector<8x128xf32> -> vector<8x128xf32>
    %379 = arith.addf %377, %378 : vector<8x128xf32>
    %380 = vector.extract_strided_slice %379 {offsets = [0, 0], sizes = [8, 32], strides = [1, 1]} : vector<8x128xf32> to vector<8x32xf32>
    %cst_146 = arith.constant 5.000000e-01 : f32
    %381 = vector.broadcast %cst_146 : f32 to vector<8x32xf32>
    %382 = arith.mulf %381, %380 : vector<8x32xf32>
    %383 = math.tanh %382 : vector<8x32xf32>
    %cst_147 = arith.constant 1.000000e+00 : f32
    %384 = vector.broadcast %cst_147 : f32 to vector<8x32xf32>
    %385 = arith.addf %383, %384 : vector<8x32xf32>
    %cst_148 = arith.constant 5.000000e-01 : f32
    %386 = vector.broadcast %cst_148 : f32 to vector<8x32xf32>
    %387 = arith.mulf %386, %385 : vector<8x32xf32>
    %388 = vector.extract_strided_slice %379 {offsets = [0, 32], sizes = [8, 32], strides = [1, 1]} : vector<8x128xf32> to vector<8x32xf32>
    %cst_149 = arith.constant 5.000000e-01 : f32
    %389 = vector.broadcast %cst_149 : f32 to vector<8x32xf32>
    %390 = arith.mulf %389, %388 : vector<8x32xf32>
    %391 = math.tanh %390 : vector<8x32xf32>
    %cst_150 = arith.constant 1.000000e+00 : f32
    %392 = vector.broadcast %cst_150 : f32 to vector<8x32xf32>
    %393 = arith.addf %391, %392 : vector<8x32xf32>
    %cst_151 = arith.constant 5.000000e-01 : f32
    %394 = vector.broadcast %cst_151 : f32 to vector<8x32xf32>
    %395 = arith.mulf %394, %393 : vector<8x32xf32>
    %396 = vector.extract_strided_slice %379 {offsets = [0, 64], sizes = [8, 32], strides = [1, 1]} : vector<8x128xf32> to vector<8x32xf32>
    %397 = math.tanh %396 : vector<8x32xf32>
    %398 = vector.extract_strided_slice %379 {offsets = [0, 96], sizes = [8, 32], strides = [1, 1]} : vector<8x128xf32> to vector<8x32xf32>
    %cst_152 = arith.constant 5.000000e-01 : f32
    %399 = vector.broadcast %cst_152 : f32 to vector<8x32xf32>
    %400 = arith.mulf %399, %398 : vector<8x32xf32>
    %401 = math.tanh %400 : vector<8x32xf32>
    %cst_153 = arith.constant 1.000000e+00 : f32
    %402 = vector.broadcast %cst_153 : f32 to vector<8x32xf32>
    %403 = arith.addf %401, %402 : vector<8x32xf32>
    %cst_154 = arith.constant 5.000000e-01 : f32
    %404 = vector.broadcast %cst_154 : f32 to vector<8x32xf32>
    %405 = arith.mulf %404, %403 : vector<8x32xf32>
    %406 = arith.mulf %395, %336 : vector<8x32xf32>
    %407 = arith.mulf %387, %397 : vector<8x32xf32>
    %408 = arith.addf %406, %407 : vector<8x32xf32>
    %409 = math.tanh %408 : vector<8x32xf32>
    %410 = arith.mulf %405, %409 : vector<8x32xf32>
    %411 = tpu.concatenate %410, %372 in 1 : vector<8x32xf32>, vector<8x32xf32> -> vector<8x64xf32>
    %cst_155 = arith.constant dense<0.000000e+00> : vector<8x128xf32>
    %412 = tpu.matmul %411, %4, %cst_155 {dimension_numbers = #tpu.dot_dimension_numbers<[1], [0], [0], [1], [0, 0, 1, 1], [], []>} : vector<8x64xf32>, vector<64x128xf32>, vector<8x128xf32> -> vector<8x128xf32>
    %413 = arith.addf %412, %7 : vector<8x128xf32>
    %414 = vector.extract_strided_slice %413 {offsets = [0, 0], sizes = [8, 32], strides = [1, 1]} : vector<8x128xf32> to vector<8x32xf32>
    %cst_156 = arith.constant 5.000000e-01 : f32
    %415 = vector.broadcast %cst_156 : f32 to vector<8x32xf32>
    %416 = arith.mulf %415, %414 : vector<8x32xf32>
    %417 = math.tanh %416 : vector<8x32xf32>
    %cst_157 = arith.constant 1.000000e+00 : f32
    %418 = vector.broadcast %cst_157 : f32 to vector<8x32xf32>
    %419 = arith.addf %417, %418 : vector<8x32xf32>
    %cst_158 = arith.constant 5.000000e-01 : f32
    %420 = vector.broadcast %cst_158 : f32 to vector<8x32xf32>
    %421 = arith.mulf %420, %419 : vector<8x32xf32>
    %422 = vector.extract_strided_slice %413 {offsets = [0, 32], sizes = [8, 32], strides = [1, 1]} : vector<8x128xf32> to vector<8x32xf32>
    %cst_159 = arith.constant 5.000000e-01 : f32
    %423 = vector.broadcast %cst_159 : f32 to vector<8x32xf32>
    %424 = arith.mulf %423, %422 : vector<8x32xf32>
    %425 = math.tanh %424 : vector<8x32xf32>
    %cst_160 = arith.constant 1.000000e+00 : f32
    %426 = vector.broadcast %cst_160 : f32 to vector<8x32xf32>
    %427 = arith.addf %425, %426 : vector<8x32xf32>
    %cst_161 = arith.constant 5.000000e-01 : f32
    %428 = vector.broadcast %cst_161 : f32 to vector<8x32xf32>
    %429 = arith.mulf %428, %427 : vector<8x32xf32>
    %430 = vector.extract_strided_slice %413 {offsets = [0, 64], sizes = [8, 32], strides = [1, 1]} : vector<8x128xf32> to vector<8x32xf32>
    %431 = math.tanh %430 : vector<8x32xf32>
    %432 = vector.extract_strided_slice %413 {offsets = [0, 96], sizes = [8, 32], strides = [1, 1]} : vector<8x128xf32> to vector<8x32xf32>
    %cst_162 = arith.constant 5.000000e-01 : f32
    %433 = vector.broadcast %cst_162 : f32 to vector<8x32xf32>
    %434 = arith.mulf %433, %432 : vector<8x32xf32>
    %435 = math.tanh %434 : vector<8x32xf32>
    %cst_163 = arith.constant 1.000000e+00 : f32
    %436 = vector.broadcast %cst_163 : f32 to vector<8x32xf32>
    %437 = arith.addf %435, %436 : vector<8x32xf32>
    %cst_164 = arith.constant 5.000000e-01 : f32
    %438 = vector.broadcast %cst_164 : f32 to vector<8x32xf32>
    %439 = arith.mulf %438, %437 : vector<8x32xf32>
    %440 = arith.mulf %429, %370 : vector<8x32xf32>
    %441 = arith.mulf %421, %431 : vector<8x32xf32>
    %442 = arith.addf %440, %441 : vector<8x32xf32>
    %443 = math.tanh %442 : vector<8x32xf32>
    %444 = arith.mulf %439, %443 : vector<8x32xf32>
    %c5_165 = arith.constant 5 : index
    %c0_166 = arith.constant 0 : index
    %c0_167 = arith.constant 0 : index
    %445 = vector.load %arg6[%c5_165, %c0_166, %c0_167] : memref<8x8x32xf32, #tpu.memory_space<vmem>>, vector<1x8x32xf32>
    %446 = vector.shape_cast %445 : vector<1x8x32xf32> to vector<8x32xf32>
    %447 = vector.shape_cast %444 : vector<8x32xf32> to vector<1x8x32xf32>
    tpu.vector_store %arg6[%c5_165, %c0_166, %c0_167], %447 {strides = array<i32>} : memref<8x8x32xf32, #tpu.memory_space<vmem>>, vector<1x8x32xf32>,
    %c6 = arith.constant 6 : index
    %c0_168 = arith.constant 0 : index
    %c0_169 = arith.constant 0 : index
    %448 = vector.load %arg2[%c6, %c0_168, %c0_169] : memref<8x8x128xf32, #tpu.memory_space<vmem>>, vector<1x8x128xf32>
    %449 = vector.shape_cast %448 : vector<1x8x128xf32> to vector<8x128xf32>
    %cst_170 = arith.constant dense<0.000000e+00> : vector<8x128xf32>
    %450 = tpu.matmul %410, %3, %cst_170 {dimension_numbers = #tpu.dot_dimension_numbers<[1], [0], [0], [1], [0, 0, 1, 1], [], []>} : vector<8x32xf32>, vector<32x128xf32>, vector<8x128xf32> -> vector<8x128xf32>
    %451 = arith.addf %449, %450 : vector<8x128xf32>
    %452 = vector.extract_strided_slice %451 {offsets = [0, 0], sizes = [8, 32], strides = [1, 1]} : vector<8x128xf32> to vector<8x32xf32>
    %cst_171 = arith.constant 5.000000e-01 : f32
    %453 = vector.broadcast %cst_171 : f32 to vector<8x32xf32>
    %454 = arith.mulf %453, %452 : vector<8x32xf32>
    %455 = math.tanh %454 : vector<8x32xf32>
    %cst_172 = arith.constant 1.000000e+00 : f32
    %456 = vector.broadcast %cst_172 : f32 to vector<8x32xf32>
    %457 = arith.addf %455, %456 : vector<8x32xf32>
    %cst_173 = arith.constant 5.000000e-01 : f32
    %458 = vector.broadcast %cst_173 : f32 to vector<8x32xf32>
    %459 = arith.mulf %458, %457 : vector<8x32xf32>
    %460 = vector.extract_strided_slice %451 {offsets = [0, 32], sizes = [8, 32], strides = [1, 1]} : vector<8x128xf32> to vector<8x32xf32>
    %cst_174 = arith.constant 5.000000e-01 : f32
    %461 = vector.broadcast %cst_174 : f32 to vector<8x32xf32>
    %462 = arith.mulf %461, %460 : vector<8x32xf32>
    %463 = math.tanh %462 : vector<8x32xf32>
    %cst_175 = arith.constant 1.000000e+00 : f32
    %464 = vector.broadcast %cst_175 : f32 to vector<8x32xf32>
    %465 = arith.addf %463, %464 : vector<8x32xf32>
    %cst_176 = arith.constant 5.000000e-01 : f32
    %466 = vector.broadcast %cst_176 : f32 to vector<8x32xf32>
    %467 = arith.mulf %466, %465 : vector<8x32xf32>
    %468 = vector.extract_strided_slice %451 {offsets = [0, 64], sizes = [8, 32], strides = [1, 1]} : vector<8x128xf32> to vector<8x32xf32>
    %469 = math.tanh %468 : vector<8x32xf32>
    %470 = vector.extract_strided_slice %451 {offsets = [0, 96], sizes = [8, 32], strides = [1, 1]} : vector<8x128xf32> to vector<8x32xf32>
    %cst_177 = arith.constant 5.000000e-01 : f32
    %471 = vector.broadcast %cst_177 : f32 to vector<8x32xf32>
    %472 = arith.mulf %471, %470 : vector<8x32xf32>
    %473 = math.tanh %472 : vector<8x32xf32>
    %cst_178 = arith.constant 1.000000e+00 : f32
    %474 = vector.broadcast %cst_178 : f32 to vector<8x32xf32>
    %475 = arith.addf %473, %474 : vector<8x32xf32>
    %cst_179 = arith.constant 5.000000e-01 : f32
    %476 = vector.broadcast %cst_179 : f32 to vector<8x32xf32>
    %477 = arith.mulf %476, %475 : vector<8x32xf32>
    %478 = arith.mulf %467, %408 : vector<8x32xf32>
    %479 = arith.mulf %459, %469 : vector<8x32xf32>
    %480 = arith.addf %478, %479 : vector<8x32xf32>
    %481 = math.tanh %480 : vector<8x32xf32>
    %482 = arith.mulf %477, %481 : vector<8x32xf32>
    %483 = tpu.concatenate %482, %444 in 1 : vector<8x32xf32>, vector<8x32xf32> -> vector<8x64xf32>
    %cst_180 = arith.constant dense<0.000000e+00> : vector<8x128xf32>
    %484 = tpu.matmul %483, %4, %cst_180 {dimension_numbers = #tpu.dot_dimension_numbers<[1], [0], [0], [1], [0, 0, 1, 1], [], []>} : vector<8x64xf32>, vector<64x128xf32>, vector<8x128xf32> -> vector<8x128xf32>
    %485 = arith.addf %484, %7 : vector<8x128xf32>
    %486 = vector.extract_strided_slice %485 {offsets = [0, 0], sizes = [8, 32], strides = [1, 1]} : vector<8x128xf32> to vector<8x32xf32>
    %cst_181 = arith.constant 5.000000e-01 : f32
    %487 = vector.broadcast %cst_181 : f32 to vector<8x32xf32>
    %488 = arith.mulf %487, %486 : vector<8x32xf32>
    %489 = math.tanh %488 : vector<8x32xf32>
    %cst_182 = arith.constant 1.000000e+00 : f32
    %490 = vector.broadcast %cst_182 : f32 to vector<8x32xf32>
    %491 = arith.addf %489, %490 : vector<8x32xf32>
    %cst_183 = arith.constant 5.000000e-01 : f32
    %492 = vector.broadcast %cst_183 : f32 to vector<8x32xf32>
    %493 = arith.mulf %492, %491 : vector<8x32xf32>
    %494 = vector.extract_strided_slice %485 {offsets = [0, 32], sizes = [8, 32], strides = [1, 1]} : vector<8x128xf32> to vector<8x32xf32>
    %cst_184 = arith.constant 5.000000e-01 : f32
    %495 = vector.broadcast %cst_184 : f32 to vector<8x32xf32>
    %496 = arith.mulf %495, %494 : vector<8x32xf32>
    %497 = math.tanh %496 : vector<8x32xf32>
    %cst_185 = arith.constant 1.000000e+00 : f32
    %498 = vector.broadcast %cst_185 : f32 to vector<8x32xf32>
    %499 = arith.addf %497, %498 : vector<8x32xf32>
    %cst_186 = arith.constant 5.000000e-01 : f32
    %500 = vector.broadcast %cst_186 : f32 to vector<8x32xf32>
    %501 = arith.mulf %500, %499 : vector<8x32xf32>
    %502 = vector.extract_strided_slice %485 {offsets = [0, 64], sizes = [8, 32], strides = [1, 1]} : vector<8x128xf32> to vector<8x32xf32>
    %503 = math.tanh %502 : vector<8x32xf32>
    %504 = vector.extract_strided_slice %485 {offsets = [0, 96], sizes = [8, 32], strides = [1, 1]} : vector<8x128xf32> to vector<8x32xf32>
    %cst_187 = arith.constant 5.000000e-01 : f32
    %505 = vector.broadcast %cst_187 : f32 to vector<8x32xf32>
    %506 = arith.mulf %505, %504 : vector<8x32xf32>
    %507 = math.tanh %506 : vector<8x32xf32>
    %cst_188 = arith.constant 1.000000e+00 : f32
    %508 = vector.broadcast %cst_188 : f32 to vector<8x32xf32>
    %509 = arith.addf %507, %508 : vector<8x32xf32>
    %cst_189 = arith.constant 5.000000e-01 : f32
    %510 = vector.broadcast %cst_189 : f32 to vector<8x32xf32>
    %511 = arith.mulf %510, %509 : vector<8x32xf32>
    %512 = arith.mulf %501, %442 : vector<8x32xf32>
    %513 = arith.mulf %493, %503 : vector<8x32xf32>
    %514 = arith.addf %512, %513 : vector<8x32xf32>
    %515 = math.tanh %514 : vector<8x32xf32>
    %516 = arith.mulf %511, %515 : vector<8x32xf32>
    %c6_190 = arith.constant 6 : index
    %c0_191 = arith.constant 0 : index
    %c0_192 = arith.constant 0 : index
    %517 = vector.load %arg6[%c6_190, %c0_191, %c0_192] : memref<8x8x32xf32, #tpu.memory_space<vmem>>, vector<1x8x32xf32>
    %518 = vector.shape_cast %517 : vector<1x8x32xf32> to vector<8x32xf32>
    %519 = vector.shape_cast %516 : vector<8x32xf32> to vector<1x8x32xf32>
    tpu.vector_store %arg6[%c6_190, %c0_191, %c0_192], %519 {strides = array<i32>} : memref<8x8x32xf32, #tpu.memory_space<vmem>>, vector<1x8x32xf32>,
    %c7 = arith.constant 7 : index
    %c0_193 = arith.constant 0 : index
    %c0_194 = arith.constant 0 : index
    %520 = vector.load %arg2[%c7, %c0_193, %c0_194] : memref<8x8x128xf32, #tpu.memory_space<vmem>>, vector<1x8x128xf32>
    %521 = vector.shape_cast %520 : vector<1x8x128xf32> to vector<8x128xf32>
    %cst_195 = arith.constant dense<0.000000e+00> : vector<8x128xf32>
    %522 = tpu.matmul %482, %3, %cst_195 {dimension_numbers = #tpu.dot_dimension_numbers<[1], [0], [0], [1], [0, 0, 1, 1], [], []>} : vector<8x32xf32>, vector<32x128xf32>, vector<8x128xf32> -> vector<8x128xf32>
    %523 = arith.addf %521, %522 : vector<8x128xf32>
    %524 = vector.extract_strided_slice %523 {offsets = [0, 0], sizes = [8, 32], strides = [1, 1]} : vector<8x128xf32> to vector<8x32xf32>
    %cst_196 = arith.constant 5.000000e-01 : f32
    %525 = vector.broadcast %cst_196 : f32 to vector<8x32xf32>
    %526 = arith.mulf %525, %524 : vector<8x32xf32>
    %527 = math.tanh %526 : vector<8x32xf32>
    %cst_197 = arith.constant 1.000000e+00 : f32
    %528 = vector.broadcast %cst_197 : f32 to vector<8x32xf32>
    %529 = arith.addf %527, %528 : vector<8x32xf32>
    %cst_198 = arith.constant 5.000000e-01 : f32
    %530 = vector.broadcast %cst_198 : f32 to vector<8x32xf32>
    %531 = arith.mulf %530, %529 : vector<8x32xf32>
    %532 = vector.extract_strided_slice %523 {offsets = [0, 32], sizes = [8, 32], strides = [1, 1]} : vector<8x128xf32> to vector<8x32xf32>
    %cst_199 = arith.constant 5.000000e-01 : f32
    %533 = vector.broadcast %cst_199 : f32 to vector<8x32xf32>
    %534 = arith.mulf %533, %532 : vector<8x32xf32>
    %535 = math.tanh %534 : vector<8x32xf32>
    %cst_200 = arith.constant 1.000000e+00 : f32
    %536 = vector.broadcast %cst_200 : f32 to vector<8x32xf32>
    %537 = arith.addf %535, %536 : vector<8x32xf32>
    %cst_201 = arith.constant 5.000000e-01 : f32
    %538 = vector.broadcast %cst_201 : f32 to vector<8x32xf32>
    %539 = arith.mulf %538, %537 : vector<8x32xf32>
    %540 = vector.extract_strided_slice %523 {offsets = [0, 64], sizes = [8, 32], strides = [1, 1]} : vector<8x128xf32> to vector<8x32xf32>
    %541 = math.tanh %540 : vector<8x32xf32>
    %542 = vector.extract_strided_slice %523 {offsets = [0, 96], sizes = [8, 32], strides = [1, 1]} : vector<8x128xf32> to vector<8x32xf32>
    %cst_202 = arith.constant 5.000000e-01 : f32
    %543 = vector.broadcast %cst_202 : f32 to vector<8x32xf32>
    %544 = arith.mulf %543, %542 : vector<8x32xf32>
    %545 = math.tanh %544 : vector<8x32xf32>
    %cst_203 = arith.constant 1.000000e+00 : f32
    %546 = vector.broadcast %cst_203 : f32 to vector<8x32xf32>
    %547 = arith.addf %545, %546 : vector<8x32xf32>
    %cst_204 = arith.constant 5.000000e-01 : f32
    %548 = vector.broadcast %cst_204 : f32 to vector<8x32xf32>
    %549 = arith.mulf %548, %547 : vector<8x32xf32>
    %550 = arith.mulf %539, %480 : vector<8x32xf32>
    %551 = arith.mulf %531, %541 : vector<8x32xf32>
    %552 = arith.addf %550, %551 : vector<8x32xf32>
    %553 = math.tanh %552 : vector<8x32xf32>
    %554 = arith.mulf %549, %553 : vector<8x32xf32>
    %555 = tpu.concatenate %554, %516 in 1 : vector<8x32xf32>, vector<8x32xf32> -> vector<8x64xf32>
    %cst_205 = arith.constant dense<0.000000e+00> : vector<8x128xf32>
    %556 = tpu.matmul %555, %4, %cst_205 {dimension_numbers = #tpu.dot_dimension_numbers<[1], [0], [0], [1], [0, 0, 1, 1], [], []>} : vector<8x64xf32>, vector<64x128xf32>, vector<8x128xf32> -> vector<8x128xf32>
    %557 = arith.addf %556, %7 : vector<8x128xf32>
    %558 = vector.extract_strided_slice %557 {offsets = [0, 0], sizes = [8, 32], strides = [1, 1]} : vector<8x128xf32> to vector<8x32xf32>
    %cst_206 = arith.constant 5.000000e-01 : f32
    %559 = vector.broadcast %cst_206 : f32 to vector<8x32xf32>
    %560 = arith.mulf %559, %558 : vector<8x32xf32>
    %561 = math.tanh %560 : vector<8x32xf32>
    %cst_207 = arith.constant 1.000000e+00 : f32
    %562 = vector.broadcast %cst_207 : f32 to vector<8x32xf32>
    %563 = arith.addf %561, %562 : vector<8x32xf32>
    %cst_208 = arith.constant 5.000000e-01 : f32
    %564 = vector.broadcast %cst_208 : f32 to vector<8x32xf32>
    %565 = arith.mulf %564, %563 : vector<8x32xf32>
    %566 = vector.extract_strided_slice %557 {offsets = [0, 32], sizes = [8, 32], strides = [1, 1]} : vector<8x128xf32> to vector<8x32xf32>
    %cst_209 = arith.constant 5.000000e-01 : f32
    %567 = vector.broadcast %cst_209 : f32 to vector<8x32xf32>
    %568 = arith.mulf %567, %566 : vector<8x32xf32>
    %569 = math.tanh %568 : vector<8x32xf32>
    %cst_210 = arith.constant 1.000000e+00 : f32
    %570 = vector.broadcast %cst_210 : f32 to vector<8x32xf32>
    %571 = arith.addf %569, %570 : vector<8x32xf32>
    %cst_211 = arith.constant 5.000000e-01 : f32
    %572 = vector.broadcast %cst_211 : f32 to vector<8x32xf32>
    %573 = arith.mulf %572, %571 : vector<8x32xf32>
    %574 = vector.extract_strided_slice %557 {offsets = [0, 64], sizes = [8, 32], strides = [1, 1]} : vector<8x128xf32> to vector<8x32xf32>
    %575 = math.tanh %574 : vector<8x32xf32>
    %576 = vector.extract_strided_slice %557 {offsets = [0, 96], sizes = [8, 32], strides = [1, 1]} : vector<8x128xf32> to vector<8x32xf32>
    %cst_212 = arith.constant 5.000000e-01 : f32
    %577 = vector.broadcast %cst_212 : f32 to vector<8x32xf32>
    %578 = arith.mulf %577, %576 : vector<8x32xf32>
    %579 = math.tanh %578 : vector<8x32xf32>
    %cst_213 = arith.constant 1.000000e+00 : f32
    %580 = vector.broadcast %cst_213 : f32 to vector<8x32xf32>
    %581 = arith.addf %579, %580 : vector<8x32xf32>
    %cst_214 = arith.constant 5.000000e-01 : f32
    %582 = vector.broadcast %cst_214 : f32 to vector<8x32xf32>
    %583 = arith.mulf %582, %581 : vector<8x32xf32>
    %584 = arith.mulf %573, %514 : vector<8x32xf32>
    %585 = arith.mulf %565, %575 : vector<8x32xf32>
    %586 = arith.addf %584, %585 : vector<8x32xf32>
    %587 = math.tanh %586 : vector<8x32xf32>
    %588 = arith.mulf %583, %587 : vector<8x32xf32>
    %c7_215 = arith.constant 7 : index
    %c0_216 = arith.constant 0 : index
    %c0_217 = arith.constant 0 : index
    %589 = vector.load %arg6[%c7_215, %c0_216, %c0_217] : memref<8x8x32xf32, #tpu.memory_space<vmem>>, vector<1x8x32xf32>
    %590 = vector.shape_cast %589 : vector<1x8x32xf32> to vector<8x32xf32>
    %591 = vector.shape_cast %588 : vector<8x32xf32> to vector<1x8x32xf32>
    tpu.vector_store %arg6[%c7_215, %c0_216, %c0_217], %591 {strides = array<i32>} : memref<8x8x32xf32, #tpu.memory_space<vmem>>, vector<1x8x32xf32>,
    %c0_218 = arith.constant 0 : index
    %c0_219 = arith.constant 0 : index
    %c0_220 = arith.constant 0 : index
    %592 = vector.load %arg7[%c0_218, %c0_219, %c0_220] : memref<2x8x32xf32, #tpu.memory_space<vmem>>, vector<1x8x32xf32>
    %593 = vector.shape_cast %592 : vector<1x8x32xf32> to vector<8x32xf32>
    %594 = vector.shape_cast %554 : vector<8x32xf32> to vector<1x8x32xf32>
    tpu.vector_store %arg7[%c0_218, %c0_219, %c0_220], %594 {strides = array<i32>} : memref<2x8x32xf32, #tpu.memory_space<vmem>>, vector<1x8x32xf32>,
    %c1_221 = arith.constant 1 : index
    %c0_222 = arith.constant 0 : index
    %c0_223 = arith.constant 0 : index
    %595 = vector.load %arg7[%c1_221, %c0_222, %c0_223] : memref<2x8x32xf32, #tpu.memory_space<vmem>>, vector<1x8x32xf32>
    %596 = vector.shape_cast %595 : vector<1x8x32xf32> to vector<8x32xf32>
    %597 = vector.shape_cast %588 : vector<8x32xf32> to vector<1x8x32xf32>
    tpu.vector_store %arg7[%c1_221, %c0_222, %c0_223], %597 {strides = array<i32>} : memref<2x8x32xf32, #tpu.memory_space<vmem>>, vector<1x8x32xf32>,
    %c0_224 = arith.constant 0 : index
    %c0_225 = arith.constant 0 : index
    %c0_226 = arith.constant 0 : index
    %598 = vector.load %arg8[%c0_224, %c0_225, %c0_226] : memref<2x8x32xf32, #tpu.memory_space<vmem>>, vector<1x8x32xf32>
    %599 = vector.shape_cast %598 : vector<1x8x32xf32> to vector<8x32xf32>
    %600 = vector.shape_cast %552 : vector<8x32xf32> to vector<1x8x32xf32>
    tpu.vector_store %arg8[%c0_224, %c0_225, %c0_226], %600 {strides = array<i32>} : memref<2x8x32xf32, #tpu.memory_space<vmem>>, vector<1x8x32xf32>,
    %c1_227 = arith.constant 1 : index
    %c0_228 = arith.constant 0 : index
    %c0_229 = arith.constant 0 : index
    %601 = vector.load %arg8[%c1_227, %c0_228, %c0_229] : memref<2x8x32xf32, #tpu.memory_space<vmem>>, vector<1x8x32xf32>
    %602 = vector.shape_cast %601 : vector<1x8x32xf32> to vector<8x32xf32>
    %603 = vector.shape_cast %586 : vector<8x32xf32> to vector<1x8x32xf32>
    tpu.vector_store %arg8[%c1_227, %c0_228, %c0_229], %603 {strides = array<i32>} : memref<2x8x32xf32, #tpu.memory_space<vmem>>, vector<1x8x32xf32>,
    return
  }
  func.func @transform_0(%arg0: i32, %arg1: i32) -> (i32, i32, i32) {
    %c0_i32 = arith.constant 0 : i32
    %c0_i32_0 = arith.constant 0 : i32
    return %arg1, %arg0, %c0_i32 : i32, i32, i32
  }
  func.func @transform_1(%arg0: i32, %arg1: i32) -> (i32, i32) {
    %c0_i32 = arith.constant 0 : i32
    %c0_i32_0 = arith.constant 0 : i32
    %c0_i32_1 = arith.constant 0 : i32
    return %c0_i32, %c0_i32_0 : i32, i32
  }
  func.func @transform_2(%arg0: i32, %arg1: i32) -> (i32, i32) {
    %c0_i32 = arith.constant 0 : i32
    %c0_i32_0 = arith.constant 0 : i32
    %c0_i32_1 = arith.constant 0 : i32
    return %c0_i32, %c0_i32_0 : i32, i32
  }
  func.func @transform_3(%arg0: i32, %arg1: i32) -> (i32, i32) {
    %c0_i32 = arith.constant 0 : i32
    %c0_i32_0 = arith.constant 0 : i32
    %c0_i32_1 = arith.constant 0 : i32
    return %c0_i32, %c0_i32_0 : i32, i32
  }
  func.func @transform_4(%arg0: i32, %arg1: i32) -> (i32, i32, i32) {
    %c0_i32 = arith.constant 0 : i32
    %c0_i32_0 = arith.constant 0 : i32
    return %arg1, %arg0, %c0_i32 : i32, i32, i32
  }
  func.func @transform_5(%arg0: i32, %arg1: i32) -> (i32, i32, i32) {
    %c0_i32 = arith.constant 0 : i32
    %c0_i32_0 = arith.constant 0 : i32
    %c0_i32_1 = arith.constant 0 : i32
    return %c0_i32, %arg0, %c0_i32_0 : i32, i32, i32
  }
  func.func @transform_6(%arg0: i32, %arg1: i32) -> (i32, i32, i32) {
    %c0_i32 = arith.constant 0 : i32
    %c0_i32_0 = arith.constant 0 : i32
    %c0_i32_1 = arith.constant 0 : i32
    return %c0_i32, %arg0, %c0_i32_0 : i32, i32, i32
  }
}

</mosaic_0001>

<bundles_post_ra>
// kernel: kieu_lstm_forward.3
= control target key start
LH: loop header
LB: loop body
LE: loop exit
PB: predicated region body
PF: predicated region fallthrough
CT: control target
= control target key end

     0   :  { %vm27_vm0 = vcmask 261120   ;;  %s190_s1 = inlined_call_operand.vmem [shape: f32[32,128], index: 1, kind: input, shape index: {}]   ;;  %s191_s0 = inlined_call_operand.vmem [shape: f32[16,32], index: 0, kind: input, shape index: {}]   ;;  %s192_s2 = inlined_call_operand.vmem [shape: f32[1,128], index: 2, kind: input, shape index: {}]   ;;  %s193_s3 = inlined_call_operand.vmem [shape: f32[16,128], index: 3, kind: output, shape index: {}]  }
   0x1   :  { %v16_v0 = vld [vmem:[%s190_s1] sm:$0xff]  ;;  %v17_v1 = vld [vmem:[%s190_s1 + $0x8] sm:$0xff]  ;;  %v18_v2 = vld [vmem:[%s190_s1 + $0x10] sm:$0xff] }
   0x2   :  { %v135_v3 = vpack.c.bf16 %v17_v1, %v16_v0  ;;  %v19_v4 = vld [vmem:[%s190_s1 + $0x18] sm:$0xff]  ;;  %v14_v5 = vld [vmem:[%s191_s0] sm:$0xff]  ;;  %v15_v7 = vld [vmem:[%s191_s0 + $0x8] sm:$0xff] }
   0x3   :  { %v139_v6 = vpack.c.bf16 %v19_v4, %v18_v2  ;;  %132 = vmatprep.mubr.msk.f32.mxu0 %vm27_vm0, %v14_v5  ;;  %v115_v8 = vld [vmem:[%s192_s2] ss:$0 sm:$0xff] }
   0x4   :  { %136 = vmatprep.subr.bf16.mxu0 %v135_v3 }
   0x5   :  { %138 = vmatpush3.bf16.msra.mxu0 %v135_v3 }
   0x6   :  { %140 = vmatprep.subr.bf16.mxu0 %v139_v6 }
   0x9   :  { %142 = vmatpush3.bf16.msra.mxu0 %v139_v6 }
   0xc   :  { %133 = vmatmul.mubr.msk.f32.vlgmr.msra.gmra.mrb[0].mxu0 %vm27_vm0, %v15_v7 }
  0xdf   :  { %v134_v9 = vpop.f32.mrb[0].mxu0 }
  0xe0   :  { %v106_v10 = vadd.f32 %v134_v9, %v115_v8  ;;  %v100_v11 = vpop.f32.mrb[1].mxu0 }
  0xe1   :  { %v101_v12 = vadd.f32 %v115_v8, %v100_v11 }
  0xe2   :  { %110 = vst [vmem:[%s193_s3 + $0x8] sm:$0xff] %v106_v10 }
  0xe3   :  { %109 = vst [vmem:[%s193_s3] sm:$0xff] %v101_v12 }

// kernel: kieu_lstm_forward.2
= control target key start
LH: loop header
LB: loop body
LE: loop exit
PB: predicated region body
PF: predicated region fallthrough
CT: control target
= control target key end

     0   :  { %vm24_vm0 = vcmask 261120   ;;  %v2369_v0 = vmov 0.0|0.0   ;;  %vm2370_vm1 = vmmov 0   ;;  %v2371_v4 = vmov 0.0   ;;  %s2372_s16 = smov 64   ;;  %s2373_s19 = smov 32   ;;  %s2869_s1 = inlined_call_operand.vmem [shape: f32[32,128], index: 1, kind: input, shape index: {}]   ;;  %s2870_s5 = inlined_call_operand.vmem [shape: f32[2,8,32], index: 5, kind: output, shape index: {1}]   ;;  %s2871_s6 = inlined_call_operand.vmem [shape: f32[2,8,32], index: 6, kind: output, shape index: {2}]   ;;  %s2872_s0 = inlined_call_operand.vmem [shape: f32[8,8,128], index: 0, kind: input, shape index: {}]   ;;  %s2873_s2 = inlined_call_operand.vmem [shape: f32[64,128], index: 2, kind: input, shape index: {}]   ;;  %s2874_s3 = inlined_call_operand.vmem [shape: f32[1,128], index: 3, kind: input, shape index: {}]   ;;  %s2875_s4 = inlined_call_operand.vmem [shape: f32[8,8,32], index: 4, kind: output, shape index: {0}]  }
   0x1   :  { %2123 = vmatprep.subr.bf16.mxu1 %v2369_v0  ;;  %v29_v1 = vld [vmem:[%s2869_s1] sm:$0xff]  ;;  %v30_v2 = vld [vmem:[%s2869_s1 + $0x8] sm:$0xff]  ;;  %v31_v3 = vld [vmem:[%s2869_s1 + $0x10] sm:$0xff]  ;;  %1891 = vmatprep.mubr.msk.f32.mxu1 %vm2370_vm1, %v2371_v4  ;;  %25 = vst.msk [vmem:[%s2870_s5] sm:$0xff] %vm24_vm0, %v2371_v4  ;;  %vm165_vm2 = vcmask 523264   ;;  %s2374_s8 = smov 96  }
   0x2   :  { %26 = vst.msk [vmem:[%s2870_s5 + $0x8] sm:$0xff] %vm24_vm0, %v2371_v4  ;;  %v2432_v5 = vpack.c.bf16 %v30_v2, %v29_v1  ;;  %v32_v6 = vld [vmem:[%s2869_s1 + $0x18] sm:$0xff]  ;;  %2141 = vmatprep.subr.bf16.mxu0 %v2369_v0  ;;  %1921 = vmatprep.mubr.msk.f32.mxu0 %vm2370_vm1, %v2371_v4  ;;  %27 = vst.msk [vmem:[%s2871_s6] sm:$0xff] %vm24_vm0, %v2371_v4  ;;  %v54_v9 = vld [vmem:[%s2872_s0] sm:$0xff] }
   0x3   :  { %v2441_v7 = vpack.c.bf16 %v32_v6, %v31_v3  ;;  %28 = vst.msk [vmem:[%s2871_s6 + $0x8] sm:$0xff] %vm24_vm0, %v2371_v4  ;;  %v33_v25 = vld [vmem:[%s2873_s2] sm:$0xff]  ;;  %v34_v26 = vld [vmem:[%s2873_s2 + $0x8] sm:$0xff]  ;;  %v35_v27 = vld [vmem:[%s2873_s2 + $0x10] sm:$0xff] }
   0x4   :  { %2125 = vmatpush3.bf16.msra.mxu1 %v2432_v5  ;;  %2143 = vmatpush3.bf16.msra.mxu0 %v2432_v5  ;;  %v2487_v28 = vpack.c.bf16 %v34_v26, %v33_v25  ;;  %v36_v29 = vld [vmem:[%s2873_s2 + $0x18] sm:$0xff]  ;;  %v37_v31 = vld [vmem:[%s2873_s2 + $0x20] sm:$0xff]  ;;  %v38_v32 = vld [vmem:[%s2873_s2 + $0x28] sm:$0xff] }
   0x5   :  { %2126 = vmatprep.subr.bf16.mxu1 %v2369_v0  ;;  %2144 = vmatprep.subr.bf16.mxu0 %v2369_v0  ;;  %v2493_v30 = vpack.c.bf16 %v36_v29, %v35_v27  ;;  %v2503_v33 = vpack.c.bf16 %v38_v32, %v37_v31  ;;  %v39_v34 = vld [vmem:[%s2873_s2 + $0x30] sm:$0xff]  ;;  %v40_v35 = vld [vmem:[%s2873_s2 + $0x38] sm:$0xff]  ;;  %v1741_v44 = vld [vmem:[%s2872_s0 + $0x8] sm:$0xff] }
   0x6   :  { %v2517_v38 = vpack.c.bf16 %v40_v35, %v39_v34  ;;  %v2549_v45 = vld [vmem:[%s2874_s3] ss:$0 sm:$0xff] }
   0x8   :  { %2128 = vmatpush3.bf16.msra.mxu1 %v2441_v7  ;;  %v48_v8 = vld [vmem:[%s2870_s5] sm:$0xff]  ;;  %2146 = vmatpush3.bf16.msra.mxu0 %v2441_v7 }
   0x9   :  { %2129 = vmatprep.subr.bf16.mxu1 %v2369_v0  ;;  %2147 = vmatprep.subr.bf16.mxu0 %v2369_v0  ;;  %v49_v14 = vld [vmem:[%s2871_s6] sm:$0xff]  ;;  %v1737_v37 = vld [vmem:[%s2870_s5 + $0x8] sm:$0xff] }
   0xa   :  { %v1738_v54 = vld [vmem:[%s2871_s6 + $0x8] sm:$0xff] }
   0xb   :  { %1892 = vmatmul.mubr.msk.f32.vlgmr.msra.gmra.mrb[0].mxu1 %vm24_vm0, %v48_v8 }
   0xc   :  { %1910 = vmatprep.mubr.msk.f32.mxu1 %vm2370_vm1, %v2371_v4  ;;  %2131 = vmatpush3.bf16.msra.mxu1 %v2487_v28 }
   0xd   :  { %2132 = vmatprep.subr.bf16.mxu1 %v2369_v0 }
  0x10   :  { %2134 = vmatpush3.bf16.msra.mxu1 %v2493_v30 }
  0x11   :  { %2135 = vmatprep.subr.bf16.mxu1 %v2369_v0 }
  0x14   :  { %2137 = vmatpush3.bf16.msra.mxu1 %v2503_v33 }
  0x15   :  { %2138 = vmatprep.subr.bf16.mxu1 %v2369_v0 }
  0x18   :  { %2140 = vmatpush3.bf16.msra.mxu1 %v2517_v38 }
  0x19   :  { %2159 = vmatprep.subr.bf16.mxu1 %v2369_v0 }
  0xde   :  { %v125_v10 = vpop.f32.mrb[0].mxu1 }
  0xdf   :  { %v129_v11 = vadd.f32 %v125_v10, %v54_v9  ;;  %v1893_v12 = vpop.f32.mrb[1].mxu1 }
  0xe1   :  { %2273 = vtanh.f32 %v129_v11  ;;  %v130_v15 = vmul.f32 0.5, %v129_v11 }
  0xe3   :  { %2275 = vtanh.f32 %v130_v15 }
  0xeb   :  { %v2274_v13 = vpop.eup %2273 }
  0xec   :  { %141 = vrot.lane.b32.xlu0 %v2274_v13, %s2372_s16 }
  0xed   :  { %v2276_v16 = vpop.eup %2275 }
  0xee   :  { %v132_v17 = vadd.f32 1.0, %v2276_v16 }
  0xf0   :  { %136 = vrot.lane.b32.xlu0 %v49_v14, %s2373_s19  ;;  %v133_v18 = vmul.f32 0.5, %v132_v17 }
 0x15e   :  { %v142_v19 = vpop.permute.xlu0 %141 }
 0x15f   :  { %v144_v20 = vmul.f32 %v142_v19, %v133_v18 }
 0x161   :  { %146 = vrot.lane.b32.xlu1 %v144_v20, %s2373_s19 }
 0x162   :  { %v137_v21 = vpop.permute.xlu0 %136 }
 0x163   :  { %v139_v22 = vmul.f32 %v137_v21, %v133_v18 }
 0x1d3   :  { %v147_v23 = vpop.permute.xlu1 %146 }
 0x1d4   :  { %v2475_v24 = vadd.f32 %v147_v23, %v139_v22  ;;  %v1745_v23 = vld [vmem:[%s2872_s0 + $0x10] sm:$0xff] }
 0x1d6   :  { %2277 = vtanh.f32 %v2475_v24 }
 0x1e0   :  { %v2278_v36 = vpop.eup %2277 }
 0x1e1   :  { %152 = vrot.lane.b32.xlu1 %v2278_v36, %s2372_s16 }
 0x1e5   :  { %161 = vrot.lane.b32.xlu1 %v1737_v37, %s2373_s19 }
 0x253   :  { %v153_v39 = vpop.permute.xlu1 %152 }
 0x254   :  { %v155_v40 = vmul.f32 %v153_v39, %v133_v18 }
 0x256   :  { %157 = vrot.lane.b32.xlu0 %v155_v40, %s2373_s19 }
 0x257   :  { %v162_v41 = vpop.permute.xlu1 %161 }
 0x2c8   :  { %v158_v42 = vpop.permute.xlu0 %157 }
 0x2c9   :  { %v164_v43 = vsel %vm24_vm0, %v158_v42, %v162_v41  ;;  %1922 = vmatmul.mubr.msk.f32.vlgmr.msra.gmra.mrb[0].mxu0 %vm24_vm0, %v158_v42 }
 0x2ca   :  { %1911 = vmatmul.mubr.msk.f32.vlgmr.msra.gmra.mrb[2].mxu1 %vm165_vm2, %v164_v43  ;;  %2149 = vmatpush3.bf16.msra.mxu0 %v2487_v28 }
 0x2cb   :  { %2150 = vmatprep.subr.bf16.mxu0 %v2369_v0  ;;  %2161 = vmatpush3.bf16.msra.mxu1 %v2432_v5 }
 0x2cc   :  { %2162 = vmatprep.subr.bf16.mxu1 %v2369_v0  ;;  %1951 = vmatprep.mubr.msk.f32.mxu1 %vm2370_vm1, %v2371_v4 }
 0x2cd   :  { %1940 = vmatprep.mubr.msk.f32.mxu0 %vm2370_vm1, %v2371_v4 }
 0x2ce   :  { %2152 = vmatpush3.bf16.msra.mxu0 %v2493_v30 }
 0x2cf   :  { %2153 = vmatprep.subr.bf16.mxu0 %v2369_v0  ;;  %2164 = vmatpush3.bf16.msra.mxu1 %v2441_v7 }
 0x2d0   :  { %2165 = vmatprep.subr.bf16.mxu1 %v2369_v0 }
 0x2d2   :  { %2155 = vmatpush3.bf16.msra.mxu0 %v2503_v33 }
 0x2d3   :  { %2156 = vmatprep.subr.bf16.mxu0 %v2369_v0 }
 0x2d6   :  { %2158 = vmatpush3.bf16.msra.mxu0 %v2517_v38 }
 0x2d7   :  { %2177 = vmatprep.subr.bf16.mxu0 %v2369_v0 }
 0x39c   :  { %v340_v46 = vpop.f32.mrb[0].mxu0 }
 0x39d   :  { %v344_v47 = vadd.f32 %v1741_v44, %v340_v46  ;;  %v235_v48 = vpop.f32.mrb[2].mxu1  ;;  %v1923_v49 = vpop.f32.mrb[1].mxu0 }
 0x39e   :  { %v236_v50 = vadd.f32 %v2549_v45, %v235_v48  ;;  %v1912_v51 = vpop.f32.mrb[3].mxu1 }
 0x39f   :  { %2279 = vtanh.f32 %v344_v47  ;;  %v345_v55 = vmul.f32 0.5, %v344_v47 }
 0x3a0   :  { %2281 = vtanh.f32 %v236_v50  ;;  %v239_v56 = vmul.f32 0.5, %v236_v50 }
 0x3a1   :  { %2283 = vtanh.f32 %v345_v55 }
 0x3a2   :  { %2285 = vtanh.f32 %v239_v56 }
 0x3a9   :  { %v2280_v52 = vpop.eup %2279 }
 0x3aa   :  { %v2282_v53 = vpop.eup %2281  ;;  %352 = vrot.lane.b32.xlu1 %v2280_v52, %s2372_s16 }
 0x3ab   :  { %250 = vrot.lane.b32.xlu0 %v2282_v53, %s2372_s16  ;;  %v2284_v57 = vpop.eup %2283 }
 0x3ac   :  { %v2286_v58 = vpop.eup %2285  ;;  %v347_v59 = vadd.f32 1.0, %v2284_v57 }
 0x3ad   :  { %v241_v60 = vadd.f32 1.0, %v2286_v58 }
 0x3ae   :  { %v348_v61 = vmul.f32 0.5, %v347_v59 }
 0x3af   :  { %245 = vrot.lane.b32.xlu0 %v1738_v54, %s2373_s19  ;;  %v242_v63 = vmul.f32 0.5, %v241_v60 }
 0x3b0   :  { %v350_v8 = vmul.f32 %v348_v61, %v2475_v24 }
 0x41c   :  { %v353_v62 = vpop.permute.xlu1 %352 }
 0x41d   :  { %v355_v1 = vmul.f32 %v353_v62, %v348_v61  ;;  %v251_v2 = vpop.permute.xlu0 %250 }
 0x41e   :  { %v253_v3 = vmul.f32 %v251_v2, %v242_v63 }
 0x41f   :  { %357 = vrot.lane.b32.xlu0 %v355_v1, %s2373_s19  ;;  %v1749_v1 = vld [vmem:[%s2872_s0 + $0x18] sm:$0xff] }
 0x420   :  { %255 = vrot.lane.b32.xlu1 %v253_v3, %s2373_s19 }
 0x421   :  { %v246_v6 = vpop.permute.xlu0 %245 }
 0x422   :  { %v248_v9 = vmul.f32 %v246_v6, %v242_v63 }
 0x491   :  { %v358_v10 = vpop.permute.xlu0 %357 }
 0x492   :  { %v2561_v11 = vadd.f32 %v358_v10, %v350_v8  ;;  %v256_v12 = vpop.permute.xlu1 %255 }
 0x493   :  { %v2563_v13 = vadd.f32 %v256_v12, %v248_v9 }
 0x494   :  { %2287 = vtanh.f32 %v2561_v11 }
 0x495   :  { %2289 = vtanh.f32 %v2563_v13 }
 0x49e   :  { %v2288_v14 = vpop.eup %2287 }
 0x49f   :  { %v2290_v15 = vpop.eup %2289  ;;  %363 = vrot.lane.b32.xlu0 %v2288_v14, %s2372_s16 }
 0x4a0   :  { %261 = vrot.lane.b32.xlu1 %v2290_v15, %s2372_s16 }
 0x511   :  { %v364_v16 = vpop.permute.xlu0 %363 }
 0x512   :  { %v366_v17 = vmul.f32 %v364_v16, %v348_v61  ;;  %v262_v18 = vpop.permute.xlu1 %261 }
 0x513   :  { %v2569_v19 = vmul.f32 %v262_v18, %v242_v63 }
 0x514   :  { %368 = vrot.lane.b32.xlu1 %v366_v17, %s2373_s19 }
 0x515   :  { %371 = vrot.lane.b32.xlu0 %v2569_v19, %s2372_s16 }
 0x586   :  { %v369_v20 = vpop.permute.xlu1 %368 }
 0x587   :  { %v372_v21 = vpop.permute.xlu0 %371  ;;  %1952 = vmatmul.mubr.msk.f32.vlgmr.msra.gmra.mrb[4].mxu1 %vm24_vm0, %v369_v20 }
 0x588   :  { %v374_v22 = vsel %vm24_vm0, %v369_v20, %v372_v21  ;;  %2167 = vmatpush3.bf16.msra.mxu1 %v2487_v28  ;;  %1970 = vmatprep.mubr.msk.f32.mxu1 %vm2370_vm1, %v2371_v4 }
 0x589   :  { %1941 = vmatmul.mubr.msk.f32.vlgmr.msra.gmra.mrb[2].mxu0 %vm165_vm2, %v374_v22  ;;  %2168 = vmatprep.subr.bf16.mxu1 %v2369_v0 }
 0x58a   :  { %2179 = vmatpush3.bf16.msra.mxu0 %v2432_v5  ;;  %1981 = vmatprep.mubr.msk.f32.mxu0 %vm2370_vm1, %v2371_v4 }
 0x58b   :  { %2180 = vmatprep.subr.bf16.mxu0 %v2369_v0 }
 0x58c   :  { %2170 = vmatpush3.bf16.msra.mxu1 %v2493_v30 }
 0x58d   :  { %2171 = vmatprep.subr.bf16.mxu1 %v2369_v0 }
 0x58e   :  { %2182 = vmatpush3.bf16.msra.mxu0 %v2441_v7 }
 0x58f   :  { %2183 = vmatprep.subr.bf16.mxu0 %v2369_v0 }
 0x590   :  { %2173 = vmatpush3.bf16.msra.mxu1 %v2503_v33 }
 0x591   :  { %2174 = vmatprep.subr.bf16.mxu1 %v2369_v0 }
 0x594   :  { %2176 = vmatpush3.bf16.msra.mxu1 %v2517_v38 }
 0x595   :  { %2195 = vmatprep.subr.bf16.mxu1 %v2369_v0 }
 0x65a   :  { %v546_v24 = vpop.f32.mrb[4].mxu1 }
 0x65b   :  { %v550_v25 = vadd.f32 %v1745_v23, %v546_v24  ;;  %v1953_v26 = vpop.f32.mrb[5].mxu1 }
 0x65c   :  { %v444_v27 = vpop.f32.mrb[2].mxu0 }
 0x65d   :  { %2291 = vtanh.f32 %v550_v25  ;;  %v445_v29 = vadd.f32 %v2549_v45, %v444_v27  ;;  %v1942_v31 = vpop.f32.mrb[3].mxu0  ;;  %v551_v35 = vmul.f32 0.5, %v550_v25 }
 0x65f   :  { %2293 = vtanh.f32 %v445_v29  ;;  %v448_v36 = vmul.f32 0.5, %v445_v29 }
 0x660   :  { %2295 = vtanh.f32 %v551_v35 }
 0x661   :  { %2297 = vtanh.f32 %v448_v36 }
 0x667   :  { %v2292_v32 = vpop.eup %2291 }
 0x668   :  { %558 = vrot.lane.b32.xlu0 %v2292_v32, %s2372_s16 }
 0x669   :  { %v2294_v34 = vpop.eup %2293 }
 0x66a   :  { %455 = vrot.lane.b32.xlu1 %v2294_v34, %s2372_s16  ;;  %v2296_v37 = vpop.eup %2295 }
 0x66b   :  { %v2298_v39 = vpop.eup %2297  ;;  %v553_v40 = vadd.f32 1.0, %v2296_v37 }
 0x66c   :  { %v450_v41 = vadd.f32 1.0, %v2298_v39 }
 0x66d   :  { %v554_v42 = vmul.f32 0.5, %v553_v40 }
 0x66e   :  { %v451_v46 = vmul.f32 0.5, %v450_v41 }
 0x66f   :  { %v556_v49 = vmul.f32 %v554_v42, %v2561_v11 }
 0x670   :  { %v453_v52 = vmul.f32 %v451_v46, %v2563_v13 }
 0x6da   :  { %v559_v43 = vpop.permute.xlu0 %558 }
 0x6db   :  { %v561_v44 = vmul.f32 %v559_v43, %v554_v42 }
 0x6dc   :  { %v456_v47 = vpop.permute.xlu1 %455 }
 0x6dd   :  { %563 = vrot.lane.b32.xlu0 %v561_v44, %s2373_s19  ;;  %v458_v48 = vmul.f32 %v456_v47, %v451_v46 }
 0x6df   :  { %460 = vrot.lane.b32.xlu1 %v458_v48, %s2373_s19 }
 0x74f   :  { %v564_v50 = vpop.permute.xlu0 %563 }
 0x750   :  { %v2602_v51 = vadd.f32 %v564_v50, %v556_v49 }
 0x751   :  { %v461_v53 = vpop.permute.xlu1 %460 }
 0x752   :  { %2299 = vtanh.f32 %v2602_v51  ;;  %v2606_v54 = vadd.f32 %v461_v53, %v453_v52 }
 0x754   :  { %2301 = vtanh.f32 %v2606_v54 }
 0x75c   :  { %v2300_v55 = vpop.eup %2299 }
 0x75d   :  { %569 = vrot.lane.b32.xlu0 %v2300_v55, %s2372_s16 }
 0x75e   :  { %v2302_v56 = vpop.eup %2301 }
 0x75f   :  { %466 = vrot.lane.b32.xlu1 %v2302_v56, %s2372_s16 }
 0x7cf   :  { %v570_v57 = vpop.permute.xlu0 %569 }
 0x7d0   :  { %v572_v58 = vmul.f32 %v570_v57, %v554_v42 }
 0x7d1   :  { %v467_v59 = vpop.permute.xlu1 %466 }
 0x7d2   :  { %574 = vrot.lane.b32.xlu1 %v572_v58, %s2373_s19  ;;  %v2612_v60 = vmul.f32 %v467_v59, %v451_v46  ;;  %v1753_v46 = vld [vmem:[%s2872_s0 + $0x20] sm:$0xff] }
 0x7d4   :  { %577 = vrot.lane.b32.xlu0 %v2612_v60, %s2372_s16 }
 0x844   :  { %v575_v61 = vpop.permute.xlu1 %574 }
 0x845   :  { %1982 = vmatmul.mubr.msk.f32.vlgmr.msra.gmra.mrb[4].mxu0 %vm24_vm0, %v575_v61 }
 0x846   :  { %2185 = vmatpush3.bf16.msra.mxu0 %v2487_v28  ;;  %2000 = vmatprep.mubr.msk.f32.mxu0 %vm2370_vm1, %v2371_v4  ;;  %v578_v62 = vpop.permute.xlu0 %577 }
 0x847   :  { %2186 = vmatprep.subr.bf16.mxu0 %v2369_v0  ;;  %v580_v63 = vsel %vm24_vm0, %v575_v61, %v578_v62 }
 0x848   :  { %1971 = vmatmul.mubr.msk.f32.vlgmr.msra.gmra.mrb[6].mxu1 %vm165_vm2, %v580_v63 }
 0x849   :  { %2197 = vmatpush3.bf16.msra.mxu1 %v2432_v5  ;;  %2011 = vmatprep.mubr.msk.f32.mxu1 %vm2370_vm1, %v2371_v4 }
 0x84a   :  { %2188 = vmatpush3.bf16.msra.mxu0 %v2493_v30  ;;  %2198 = vmatprep.subr.bf16.mxu1 %v2369_v0 }
 0x84b   :  { %2189 = vmatprep.subr.bf16.mxu0 %v2369_v0 }
 0x84d   :  { %2200 = vmatpush3.bf16.msra.mxu1 %v2441_v7 }
 0x84e   :  { %2191 = vmatpush3.bf16.msra.mxu0 %v2503_v33  ;;  %2201 = vmatprep.subr.bf16.mxu1 %v2369_v0 }
 0x84f   :  { %2192 = vmatprep.subr.bf16.mxu0 %v2369_v0 }
 0x852   :  { %2194 = vmatpush3.bf16.msra.mxu0 %v2517_v38 }
 0x853   :  { %2213 = vmatprep.subr.bf16.mxu0 %v2369_v0 }
 0x918   :  { %v752_v2 = vpop.f32.mrb[4].mxu0 }
 0x919   :  { %v756_v3 = vadd.f32 %v1749_v1, %v752_v2  ;;  %v1983_v6 = vpop.f32.mrb[5].mxu0 }
 0x91b   :  { %2303 = vtanh.f32 %v756_v3  ;;  %v650_v8 = vpop.f32.mrb[6].mxu1  ;;  %v757_v13 = vmul.f32 0.5, %v756_v3 }
 0x91c   :  { %v651_v9 = vadd.f32 %v2549_v45, %v650_v8  ;;  %v1972_v10 = vpop.f32.mrb[7].mxu1 }
 0x91e   :  { %2305 = vtanh.f32 %v651_v9  ;;  %v654_v14 = vmul.f32 0.5, %v651_v9 }
 0x91f   :  { %2307 = vtanh.f32 %v757_v13 }
 0x920   :  { %2309 = vtanh.f32 %v654_v14 }
 0x925   :  { %v2304_v11 = vpop.eup %2303 }
 0x926   :  { %764 = vrot.lane.b32.xlu0 %v2304_v11, %s2372_s16 }
 0x928   :  { %v2306_v12 = vpop.eup %2305 }
 0x929   :  { %661 = vrot.lane.b32.xlu1 %v2306_v12, %s2372_s16  ;;  %v2308_v15 = vpop.eup %2307 }
 0x92a   :  { %v759_v16 = vadd.f32 1.0, %v2308_v15  ;;  %v2310_v17 = vpop.eup %2309 }
 0x92b   :  { %v656_v20 = vadd.f32 1.0, %v2310_v17 }
 0x92c   :  { %v760_v18 = vmul.f32 0.5, %v759_v16 }
 0x92d   :  { %v657_v23 = vmul.f32 0.5, %v656_v20 }
 0x92e   :  { %v762_v26 = vmul.f32 %v760_v18, %v2602_v51 }
 0x92f   :  { %v659_v31 = vmul.f32 %v657_v23, %v2606_v54 }
 0x998   :  { %v765_v21 = vpop.permute.xlu0 %764 }
 0x999   :  { %v767_v22 = vmul.f32 %v765_v21, %v760_v18 }
 0x99b   :  { %769 = vrot.lane.b32.xlu0 %v767_v22, %s2373_s19  ;;  %v662_v24 = vpop.permute.xlu1 %661 }
 0x99c   :  { %v664_v25 = vmul.f32 %v662_v24, %v657_v23  ;;  %v1757_v24 = vld [vmem:[%s2872_s0 + $0x28] sm:$0xff] }
 0x99e   :  { %666 = vrot.lane.b32.xlu1 %v664_v25, %s2373_s19 }
 0xa0d   :  { %v770_v27 = vpop.permute.xlu0 %769 }
 0xa0e   :  { %v2644_v29 = vadd.f32 %v770_v27, %v762_v26 }
 0xa10   :  { %2311 = vtanh.f32 %v2644_v29  ;;  %v667_v32 = vpop.permute.xlu1 %666 }
 0xa11   :  { %v2648_v34 = vadd.f32 %v667_v32, %v659_v31 }
 0xa13   :  { %2313 = vtanh.f32 %v2648_v34 }
 0xa1a   :  { %v2312_v35 = vpop.eup %2311 }
 0xa1b   :  { %775 = vrot.lane.b32.xlu0 %v2312_v35, %s2372_s16 }
 0xa1d   :  { %v2314_v36 = vpop.eup %2313 }
 0xa1e   :  { %672 = vrot.lane.b32.xlu1 %v2314_v36, %s2372_s16 }
 0xa8d   :  { %v776_v37 = vpop.permute.xlu0 %775 }
 0xa8e   :  { %v778_v39 = vmul.f32 %v776_v37, %v760_v18 }
 0xa90   :  { %780 = vrot.lane.b32.xlu1 %v778_v39, %s2373_s19  ;;  %v673_v40 = vpop.permute.xlu1 %672 }
 0xa91   :  { %v2654_v41 = vmul.f32 %v673_v40, %v657_v23 }
 0xa93   :  { %783 = vrot.lane.b32.xlu0 %v2654_v41, %s2372_s16 }
 0xb02   :  { %v781_v42 = vpop.permute.xlu1 %780 }
 0xb03   :  { %2012 = vmatmul.mubr.msk.f32.vlgmr.msra.gmra.mrb[8].mxu1 %vm24_vm0, %v781_v42 }
 0xb04   :  { %2203 = vmatpush3.bf16.msra.mxu1 %v2487_v28  ;;  %2030 = vmatprep.mubr.msk.f32.mxu1 %vm2370_vm1, %v2371_v4 }
 0xb05   :  { %2204 = vmatprep.subr.bf16.mxu1 %v2369_v0  ;;  %v784_v43 = vpop.permute.xlu0 %783 }
 0xb06   :  { %v786_v44 = vsel %vm24_vm0, %v781_v42, %v784_v43 }
 0xb07   :  { %2001 = vmatmul.mubr.msk.f32.vlgmr.msra.gmra.mrb[6].mxu0 %vm165_vm2, %v786_v44 }
 0xb08   :  { %2206 = vmatpush3.bf16.msra.mxu1 %v2493_v30  ;;  %2215 = vmatpush3.bf16.msra.mxu0 %v2432_v5 }
 0xb09   :  { %2207 = vmatprep.subr.bf16.mxu1 %v2369_v0  ;;  %2216 = vmatprep.subr.bf16.mxu0 %v2369_v0 }
 0xb0a   :  { %2041 = vmatprep.mubr.msk.f32.mxu0 %vm2370_vm1, %v2371_v4 }
 0xb0c   :  { %2209 = vmatpush3.bf16.msra.mxu1 %v2503_v33  ;;  %2218 = vmatpush3.bf16.msra.mxu0 %v2441_v7 }
 0xb0d   :  { %2210 = vmatprep.subr.bf16.mxu1 %v2369_v0  ;;  %2219 = vmatprep.subr.bf16.mxu0 %v2369_v0 }
 0xb10   :  { %2212 = vmatpush3.bf16.msra.mxu1 %v2517_v38 }
 0xb11   :  { %2231 = vmatprep.subr.bf16.mxu1 %v2369_v0 }
 0xbd6   :  { %v958_v47 = vpop.f32.mrb[8].mxu1 }
 0xbd7   :  { %v962_v48 = vadd.f32 %v1753_v46, %v958_v47  ;;  %v2013_v49 = vpop.f32.mrb[9].mxu1 }
 0xbd9   :  { %2315 = vtanh.f32 %v962_v48  ;;  %v963_v55 = vmul.f32 0.5, %v962_v48 }
 0xbda   :  { %v856_v50 = vpop.f32.mrb[6].mxu0 }
 0xbdb   :  { %v857_v51 = vadd.f32 %v2549_v45, %v856_v50  ;;  %v2002_v52 = vpop.f32.mrb[7].mxu0 }
 0xbdd   :  { %2317 = vtanh.f32 %v857_v51  ;;  %v860_v56 = vmul.f32 0.5, %v857_v51 }
 0xbde   :  { %2319 = vtanh.f32 %v963_v55 }
 0xbdf   :  { %2321 = vtanh.f32 %v860_v56 }
 0xbe3   :  { %v2316_v53 = vpop.eup %2315 }
 0xbe4   :  { %970 = vrot.lane.b32.xlu0 %v2316_v53, %s2372_s16 }
 0xbe7   :  { %v2318_v54 = vpop.eup %2317 }
 0xbe8   :  { %867 = vrot.lane.b32.xlu1 %v2318_v54, %s2372_s16  ;;  %v2320_v57 = vpop.eup %2319 }
 0xbe9   :  { %v965_v58 = vadd.f32 1.0, %v2320_v57  ;;  %v2322_v59 = vpop.eup %2321 }
 0xbea   :  { %v862_v63 = vadd.f32 1.0, %v2322_v59 }
 0xbeb   :  { %v966_v61 = vmul.f32 0.5, %v965_v58 }
 0xbec   :  { %v863_v2 = vmul.f32 0.5, %v862_v63 }
 0xbed   :  { %v968_v8 = vmul.f32 %v966_v61, %v2644_v29 }
 0xbee   :  { %v865_v11 = vmul.f32 %v863_v2, %v2648_v34 }
 0xc56   :  { %v971_v62 = vpop.permute.xlu0 %970 }
 0xc57   :  { %v973_v1 = vmul.f32 %v971_v62, %v966_v61 }
 0xc59   :  { %975 = vrot.lane.b32.xlu0 %v973_v1, %s2373_s19 }
 0xc5a   :  { %v868_v3 = vpop.permute.xlu1 %867 }
 0xc5b   :  { %v870_v6 = vmul.f32 %v868_v3, %v863_v2 }
 0xc5d   :  { %872 = vrot.lane.b32.xlu1 %v870_v6, %s2373_s19  ;;  %v1761_v6 = vld [vmem:[%s2872_s0 + $0x30] sm:$0xff] }
 0xccb   :  { %v976_v9 = vpop.permute.xlu0 %975 }
 0xccc   :  { %v2686_v10 = vadd.f32 %v976_v9, %v968_v8 }
 0xcce   :  { %2323 = vtanh.f32 %v2686_v10 }
 0xccf   :  { %v873_v12 = vpop.permute.xlu1 %872 }
 0xcd0   :  { %v2690_v13 = vadd.f32 %v873_v12, %v865_v11 }
 0xcd2   :  { %2325 = vtanh.f32 %v2690_v13 }
 0xcd8   :  { %v2324_v14 = vpop.eup %2323 }
 0xcd9   :  { %981 = vrot.lane.b32.xlu0 %v2324_v14, %s2372_s16 }
 0xcdc   :  { %v2326_v15 = vpop.eup %2325 }
 0xcdd   :  { %878 = vrot.lane.b32.xlu1 %v2326_v15, %s2372_s16 }
 0xd4b   :  { %v982_v16 = vpop.permute.xlu0 %981 }
 0xd4c   :  { %v984_v17 = vmul.f32 %v982_v16, %v966_v61 }
 0xd4e   :  { %986 = vrot.lane.b32.xlu1 %v984_v17, %s2373_s19 }
 0xd4f   :  { %v879_v18 = vpop.permute.xlu1 %878 }
 0xd50   :  { %v2696_v20 = vmul.f32 %v879_v18, %v863_v2 }
 0xd52   :  { %989 = vrot.lane.b32.xlu0 %v2696_v20, %s2372_s16 }
 0xdc0   :  { %v987_v21 = vpop.permute.xlu1 %986 }
 0xdc1   :  { %2042 = vmatmul.mubr.msk.f32.vlgmr.msra.gmra.mrb[8].mxu0 %vm24_vm0, %v987_v21 }
 0xdc2   :  { %2221 = vmatpush3.bf16.msra.mxu0 %v2487_v28  ;;  %2060 = vmatprep.mubr.msk.f32.mxu0 %vm2370_vm1, %v2371_v4 }
 0xdc3   :  { %2222 = vmatprep.subr.bf16.mxu0 %v2369_v0 }
 0xdc4   :  { %v990_v22 = vpop.permute.xlu0 %989 }
 0xdc5   :  { %v992_v23 = vsel %vm24_vm0, %v987_v21, %v990_v22 }
 0xdc6   :  { %2224 = vmatpush3.bf16.msra.mxu0 %v2493_v30  ;;  %2031 = vmatmul.mubr.msk.f32.vlgmr.msra.gmra.mrb[10].mxu1 %vm165_vm2, %v992_v23 }
 0xdc7   :  { %2225 = vmatprep.subr.bf16.mxu0 %v2369_v0  ;;  %2233 = vmatpush3.bf16.msra.mxu1 %v2432_v5 }
 0xdc8   :  { %2071 = vmatprep.mubr.msk.f32.mxu1 %vm2370_vm1, %v2371_v4  ;;  %2234 = vmatprep.subr.bf16.mxu1 %v2369_v0 }
 0xdca   :  { %2227 = vmatpush3.bf16.msra.mxu0 %v2503_v33 }
 0xdcb   :  { %2228 = vmatprep.subr.bf16.mxu0 %v2369_v0  ;;  %2236 = vmatpush3.bf16.msra.mxu1 %v2441_v7 }
 0xdcc   :  { %2237 = vmatprep.subr.bf16.mxu1 %v2369_v0 }
 0xdce   :  { %2230 = vmatpush3.bf16.msra.mxu0 %v2517_v38 }
 0xdcf   :  { %2249 = vmatprep.subr.bf16.mxu0 %v2369_v0 }
 0xe94   :  { %v1164_v25 = vpop.f32.mrb[8].mxu0 }
 0xe95   :  { %v1168_v26 = vadd.f32 %v1757_v24, %v1164_v25  ;;  %v2043_v27 = vpop.f32.mrb[9].mxu0 }
 0xe97   :  { %2327 = vtanh.f32 %v1168_v26  ;;  %v1169_v36 = vmul.f32 0.5, %v1168_v26 }
 0xe99   :  { %v1062_v29 = vpop.f32.mrb[10].mxu1 }
 0xe9a   :  { %v1063_v31 = vadd.f32 %v2549_v45, %v1062_v29  ;;  %v2032_v32 = vpop.f32.mrb[11].mxu1 }
 0xe9c   :  { %2329 = vtanh.f32 %v1063_v31  ;;  %v1066_v37 = vmul.f32 0.5, %v1063_v31 }
 0xe9d   :  { %2331 = vtanh.f32 %v1169_v36 }
 0xe9e   :  { %2333 = vtanh.f32 %v1066_v37 }
 0xea1   :  { %v2328_v34 = vpop.eup %2327 }
 0xea2   :  { %1176 = vrot.lane.b32.xlu0 %v2328_v34, %s2372_s16 }
 0xea6   :  { %v2330_v35 = vpop.eup %2329 }
 0xea7   :  { %1073 = vrot.lane.b32.xlu1 %v2330_v35, %s2372_s16  ;;  %v2332_v39 = vpop.eup %2331 }
 0xea8   :  { %v1171_v40 = vadd.f32 1.0, %v2332_v39  ;;  %v2334_v42 = vpop.eup %2333 }
 0xea9   :  { %v1068_v47 = vadd.f32 1.0, %v2334_v42 }
 0xeaa   :  { %v1172_v43 = vmul.f32 0.5, %v1171_v40 }
 0xeab   :  { %v1069_v48 = vmul.f32 0.5, %v1068_v47 }
 0xeac   :  { %v1174_v51 = vmul.f32 %v1172_v43, %v2686_v10 }
 0xead   :  { %v1071_v54 = vmul.f32 %v1069_v48, %v2690_v13 }
 0xf14   :  { %v1177_v44 = vpop.permute.xlu0 %1176 }
 0xf15   :  { %v1179_v46 = vmul.f32 %v1177_v44, %v1172_v43 }
 0xf17   :  { %1181 = vrot.lane.b32.xlu0 %v1179_v46, %s2373_s19 }
 0xf19   :  { %v1074_v49 = vpop.permute.xlu1 %1073 }
 0xf1a   :  { %v1076_v50 = vmul.f32 %v1074_v49, %v1069_v48 }
 0xf1c   :  { %1078 = vrot.lane.b32.xlu1 %v1076_v50, %s2373_s19 }
 0xf89   :  { %v1182_v52 = vpop.permute.xlu0 %1181 }
 0xf8a   :  { %v2728_v53 = vadd.f32 %v1182_v52, %v1174_v51 }
 0xf8c   :  { %2335 = vtanh.f32 %v2728_v53 }
 0xf8e   :  { %v1079_v55 = vpop.permute.xlu1 %1078 }
 0xf8f   :  { %v2732_v56 = vadd.f32 %v1079_v55, %v1071_v54 }
 0xf91   :  { %2337 = vtanh.f32 %v2732_v56 }
 0xf96   :  { %v2336_v57 = vpop.eup %2335 }
 0xf97   :  { %1187 = vrot.lane.b32.xlu0 %v2336_v57, %s2372_s16 }
 0xf9b   :  { %v2338_v58 = vpop.eup %2337 }
 0xf9c   :  { %1084 = vrot.lane.b32.xlu1 %v2338_v58, %s2372_s16 }
0x1009   :  { %v1188_v59 = vpop.permute.xlu0 %1187 }
0x100a   :  { %v1190_v61 = vmul.f32 %v1188_v59, %v1172_v43 }
0x100c   :  { %1192 = vrot.lane.b32.xlu1 %v1190_v61, %s2373_s19 }
0x100e   :  { %v1085_v62 = vpop.permute.xlu1 %1084 }
0x100f   :  { %v2738_v63 = vmul.f32 %v1085_v62, %v1069_v48 }
0x1011   :  { %1195 = vrot.lane.b32.xlu0 %v2738_v63, %s2372_s16 }
0x107e   :  { %v1193_v1 = vpop.permute.xlu1 %1192 }
0x107f   :  { %2072 = vmatmul.mubr.msk.f32.vlgmr.msra.gmra.mrb[12].mxu1 %vm24_vm0, %v1193_v1 }
0x1080   :  { %2239 = vmatpush3.bf16.msra.mxu1 %v2487_v28  ;;  %2090 = vmatprep.mubr.msk.f32.mxu1 %vm2370_vm1, %v2371_v4 }
0x1081   :  { %2240 = vmatprep.subr.bf16.mxu1 %v2369_v0 }
0x1083   :  { %v1196_v2 = vpop.permute.xlu0 %1195 }
0x1084   :  { %2242 = vmatpush3.bf16.msra.mxu1 %v2493_v30  ;;  %v1198_v3 = vsel %vm24_vm0, %v1193_v1, %v1196_v2 }
0x1085   :  { %2243 = vmatprep.subr.bf16.mxu1 %v2369_v0  ;;  %2061 = vmatmul.mubr.msk.f32.vlgmr.msra.gmra.mrb[10].mxu0 %vm165_vm2, %v1198_v3 }
0x1086   :  { %2251 = vmatpush3.bf16.msra.mxu0 %v2432_v5  ;;  %2101 = vmatprep.mubr.msk.f32.mxu0 %vm2370_vm1, %v2371_v4 }
0x1087   :  { %2252 = vmatprep.subr.bf16.mxu0 %v2369_v0 }
0x1088   :  { %2245 = vmatpush3.bf16.msra.mxu1 %v2503_v33 }
0x1089   :  { %2246 = vmatprep.subr.bf16.mxu1 %v2369_v0 }
0x108a   :  { %2254 = vmatpush3.bf16.msra.mxu0 %v2441_v7 }
0x108b   :  { %2255 = vmatprep.subr.bf16.mxu0 %v2369_v0 }
0x108c   :  { %2248 = vmatpush3.bf16.msra.mxu1 %v2517_v38 }
0x1152   :  { %v1370_v5 = vpop.f32.mrb[12].mxu1 }
0x1153   :  { %v1374_v8 = vadd.f32 %v1761_v6, %v1370_v5  ;;  %v2073_v9 = vpop.f32.mrb[13].mxu1 }
0x1155   :  { %2339 = vtanh.f32 %v1374_v8  ;;  %v1375_v14 = vmul.f32 0.5, %v1374_v8 }
0x1158   :  { %v1268_v10 = vpop.f32.mrb[10].mxu0 }
0x1159   :  { %v1269_v11 = vadd.f32 %v2549_v45, %v1268_v10  ;;  %v2062_v12 = vpop.f32.mrb[11].mxu0 }
0x115b   :  { %2341 = vtanh.f32 %v1269_v11  ;;  %v1272_v15 = vmul.f32 0.5, %v1269_v11 }
0x115c   :  { %2343 = vtanh.f32 %v1375_v14 }
0x115d   :  { %2345 = vtanh.f32 %v1272_v15 }
0x115f   :  { %v2340_v13 = vpop.eup %2339 }
0x1160   :  { %1382 = vrot.lane.b32.xlu0 %v2340_v13, %s2372_s16 }
0x1165   :  { %v2342_v7 = vpop.eup %2341 }
0x1166   :  { %1279 = vrot.lane.b32.xlu1 %v2342_v7, %s2372_s16  ;;  %v2344_v16 = vpop.eup %2343 }
0x1167   :  { %v1377_v17 = vadd.f32 1.0, %v2344_v16  ;;  %v2346_v18 = vpop.eup %2345 }
0x1168   :  { %v1274_v24 = vadd.f32 1.0, %v2346_v18 }
0x1169   :  { %v1378_v21 = vmul.f32 0.5, %v1377_v17 }
0x116a   :  { %v1275_v25 = vmul.f32 0.5, %v1274_v24 }
0x116b   :  { %v1380_v29 = vmul.f32 %v1378_v21, %v2728_v53 }
0x116c   :  { %v1277_v34 = vmul.f32 %v1275_v25, %v2732_v56 }
0x11d2   :  { %v1383_v22 = vpop.permute.xlu0 %1382 }
0x11d3   :  { %v1385_v23 = vmul.f32 %v1383_v22, %v1378_v21 }
0x11d5   :  { %1387 = vrot.lane.b32.xlu0 %v1385_v23, %s2373_s19 }
0x11d8   :  { %v1280_v26 = vpop.permute.xlu1 %1279 }
0x11d9   :  { %v1282_v27 = vmul.f32 %v1280_v26, %v1275_v25 }
0x11db   :  { %1284 = vrot.lane.b32.xlu1 %v1282_v27, %s2373_s19 }
0x1247   :  { %v1388_v31 = vpop.permute.xlu0 %1387 }
0x1248   :  { %v1390_v32 = vadd.f32 %v1388_v31, %v1380_v29 }
0x124a   :  { %2347 = vtanh.f32 %v1390_v32 }
0x124d   :  { %v1285_v35 = vpop.permute.xlu1 %1284 }
0x124e   :  { %v1287_v36 = vadd.f32 %v1285_v35, %v1277_v34 }
0x1250   :  { %2349 = vtanh.f32 %v1287_v36 }
0x1254   :  { %v2348_v37 = vpop.eup %2347 }
0x1255   :  { %1393 = vrot.lane.b32.xlu0 %v2348_v37, %s2372_s16 }
0x125a   :  { %v2350_v39 = vpop.eup %2349 }
0x125b   :  { %1290 = vrot.lane.b32.xlu1 %v2350_v39, %s2372_s16 }
0x12c7   :  { %v1394_v40 = vpop.permute.xlu0 %1393 }
0x12c8   :  { %v1396_v42 = vmul.f32 %v1394_v40, %v1378_v21 }
0x12ca   :  { %1398 = vrot.lane.b32.xlu1 %v1396_v42, %s2373_s19 }
0x12cd   :  { %v1291_v43 = vpop.permute.xlu1 %1290 }
0x12ce   :  { %v2773_v44 = vmul.f32 %v1291_v43, %v1275_v25 }
0x12d0   :  { %1401 = vrot.lane.b32.xlu0 %v2773_v44, %s2372_s16 }
0x133c   :  { %v1399_v46 = vpop.permute.xlu1 %1398 }
0x133d   :  { %2102 = vmatmul.mubr.msk.f32.vlgmr.msra.gmra.mrb[12].mxu0 %vm24_vm0, %v1399_v46 }
0x133e   :  { %2257 = vmatpush3.bf16.msra.mxu0 %v2487_v28  ;;  %2120 = vmatprep.mubr.msk.f32.mxu0 %vm2370_vm1, %v2371_v4  ;;  %v1765_v4 = vld [vmem:[%s2872_s0 + $0x38] sm:$0xff] }
0x133f   :  { %2258 = vmatprep.subr.bf16.mxu0 %v2369_v0 }
0x1342   :  { %2260 = vmatpush3.bf16.msra.mxu0 %v2493_v30  ;;  %v1402_v47 = vpop.permute.xlu0 %1401 }
0x1343   :  { %2261 = vmatprep.subr.bf16.mxu0 %v2369_v0  ;;  %v1404_v48 = vsel %vm24_vm0, %v1399_v46, %v1402_v47 }
0x1344   :  { %2091 = vmatmul.mubr.msk.f32.vlgmr.msra.gmra.mrb[14].mxu1 %vm165_vm2, %v1404_v48 }
0x1346   :  { %2263 = vmatpush3.bf16.msra.mxu0 %v2503_v33 }
0x1347   :  { %2264 = vmatprep.subr.bf16.mxu0 %v2369_v0 }
0x134a   :  { %2266 = vmatpush3.bf16.msra.mxu0 %v2517_v38 }
0x1410   :  { %v1576_v28 = vpop.f32.mrb[12].mxu0 }
0x1411   :  { %v1580_v49 = vadd.f32 %v1765_v4, %v1576_v28  ;;  %v2103_v30 = vpop.f32.mrb[13].mxu0 }
0x1413   :  { %2351 = vtanh.f32 %v1580_v49  ;;  %v1581_v0 = vmul.f32 0.5, %v1580_v49 }
0x1417   :  { %v1474_v50 = vpop.f32.mrb[14].mxu1 }
0x1418   :  { %v1475_v51 = vadd.f32 %v2549_v45, %v1474_v50  ;;  %v2092_v52 = vpop.f32.mrb[15].mxu1 }
0x141a   :  { %2353 = vtanh.f32 %v1475_v51  ;;  %v1478_v38 = vmul.f32 0.5, %v1475_v51 }
0x141b   :  { %2355 = vtanh.f32 %v1581_v0 }
0x141c   :  { %2357 = vtanh.f32 %v1478_v38 }
0x141d   :  { %v2352_v53 = vpop.eup %2351 }
0x141e   :  { %1588 = vrot.lane.b32.xlu0 %v2352_v53, %s2372_s16 }
0x1424   :  { %v2354_v33 = vpop.eup %2353 }
0x1425   :  { %1485 = vrot.lane.b32.xlu1 %v2354_v33, %s2372_s16  ;;  %v2356_v54 = vpop.eup %2355 }
0x1426   :  { %v1583_v55 = vadd.f32 1.0, %v2356_v54  ;;  %v2358_v57 = vpop.eup %2357 }
0x1427   :  { %v1480_v61 = vadd.f32 1.0, %v2358_v57 }
0x1428   :  { %v1584_v56 = vmul.f32 0.5, %v1583_v55 }
0x1429   :  { %v1481_v62 = vmul.f32 0.5, %v1480_v61 }
0x142a   :  { %v1586_v3 = vmul.f32 %v1584_v56, %v1390_v32 }
0x142b   :  { %v1483_v8 = vmul.f32 %v1481_v62, %v1287_v36 }
0x1490   :  { %v1589_v58 = vpop.permute.xlu0 %1588 }
0x1491   :  { %v1591_v59 = vmul.f32 %v1589_v58, %v1584_v56 }
0x1493   :  { %1593 = vrot.lane.b32.xlu0 %v1591_v59, %s2373_s19 }
0x1497   :  { %v1486_v1 = vpop.permute.xlu1 %1485 }
0x1498   :  { %v1488_v2 = vmul.f32 %v1486_v1, %v1481_v62 }
0x149a   :  { %1490 = vrot.lane.b32.xlu1 %v1488_v2, %s2373_s19 }
0x1505   :  { %v1594_v6 = vpop.permute.xlu0 %1593 }
0x1506   :  { %v1596_v5 = vadd.f32 %v1594_v6, %v1586_v3 }
0x1508   :  { %2359 = vtanh.f32 %v1596_v5 }
0x150c   :  { %v1491_v9 = vpop.permute.xlu1 %1490 }
0x150d   :  { %v1493_v10 = vadd.f32 %v1491_v9, %v1483_v8 }
0x150f   :  { %2361 = vtanh.f32 %v1493_v10 }
0x1512   :  { %v2360_v11 = vpop.eup %2359 }
0x1513   :  { %1599 = vrot.lane.b32.xlu0 %v2360_v11, %s2372_s16 }
0x1519   :  { %v2362_v12 = vpop.eup %2361 }
0x151a   :  { %1496 = vrot.lane.b32.xlu1 %v2362_v12, %s2372_s16 }
0x1585   :  { %v1600_v13 = vpop.permute.xlu0 %1599 }
0x1586   :  { %v1602_v7 = vmul.f32 %v1600_v13, %v1584_v56 }
0x1588   :  { %1604 = vrot.lane.b32.xlu1 %v1602_v7, %s2373_s19 }
0x158c   :  { %v1497_v14 = vpop.permute.xlu1 %1496 }
0x158d   :  { %v1499_v15 = vmul.f32 %v1497_v14, %v1481_v62 }
0x158f   :  { %1607 = vrot.lane.b32.xlu0 %v1499_v15, %s2372_s16 }
0x15fa   :  { %v1605_v16 = vpop.permute.xlu1 %1604 }
0x15fb   :  { %1712 = vst.msk [vmem:[%s2870_s5] sm:$0xff] %vm24_vm0, %v1605_v16 }
0x1601   :  { %v1608_v17 = vpop.permute.xlu0 %1607 }
0x1602   :  { %v1610_v18 = vsel %vm24_vm0, %v1605_v16, %v1608_v17 }
0x1603   :  { %2121 = vmatmul.mubr.msk.f32.vlgmr.msra.gmra.mrb[14].mxu0 %vm165_vm2, %v1610_v18 }
0x16d6   :  { %v1680_v21 = vpop.f32.mrb[14].mxu0 }
0x16d7   :  { %v1681_v22 = vadd.f32 %v2549_v45, %v1680_v21  ;;  %v2122_v23 = vpop.f32.mrb[15].mxu0 }
0x16d9   :  { %2363 = vtanh.f32 %v1681_v22  ;;  %v1684_v25 = vmul.f32 0.5, %v1681_v22 }
0x16db   :  { %2365 = vtanh.f32 %v1684_v25 }
0x16e3   :  { %v2364_v24 = vpop.eup %2363 }
0x16e4   :  { %1691 = vrot.lane.b32.xlu1 %v2364_v24, %s2372_s16 }
0x16e5   :  { %v2366_v26 = vpop.eup %2365 }
0x16e6   :  { %v1686_v27 = vadd.f32 1.0, %v2366_v26 }
0x16e8   :  { %v1687_v29 = vmul.f32 0.5, %v1686_v27 }
0x16ea   :  { %v1689_v45 = vmul.f32 %v1687_v29, %v1493_v10 }
0x1756   :  { %v1692_v31 = vpop.permute.xlu1 %1691 }
0x1757   :  { %v1694_v32 = vmul.f32 %v1692_v31, %v1687_v29 }
0x1759   :  { %1696 = vrot.lane.b32.xlu0 %v1694_v32, %s2373_s19 }
0x175d   :  { %266 = vrot.lane.b32.xlu0 %v2569_v19, %s2373_s19 }
0x1761   :  { %677 = vrot.lane.b32.xlu0 %v2654_v41, %s2373_s19 }
0x1765   :  { %1089 = vrot.lane.b32.xlu0 %v2738_v63, %s2373_s19 }
0x1769   :  { %1501 = vrot.lane.b32.xlu0 %v1499_v15, %s2373_s19 }
0x176d   :  { %1715 = vrot.lane.b32.xlu0 %v1596_v5, %s2374_s8 }
0x17cb   :  { %v1697_v34 = vpop.permute.xlu0 %1696 }
0x17cc   :  { %v1699_v35 = vadd.f32 %v1697_v34, %v1689_v45 }
0x17ce   :  { %2367 = vtanh.f32 %v1699_v35 }
0x17cf   :  { %v267_v36 = vpop.permute.xlu0 %266 }
0x17d0   :  { %269 = vst.msk [vmem:[%s2875_s4] sm:$0xff] %vm24_vm0, %v267_v36 }
0x17d3   :  { %v678_v19 = vpop.permute.xlu0 %677 }
0x17d4   :  { %1748 = vst.msk [vmem:[%s2875_s4 + $0x10] sm:$0xff] %vm24_vm0, %v678_v19 }
0x17d7   :  { %v1090_v41 = vpop.permute.xlu0 %1089 }
0x17d8   :  { %v2368_v63 = vpop.eup %2367  ;;  %1756 = vst.msk [vmem:[%s2875_s4 + $0x20] sm:$0xff] %vm24_vm0, %v1090_v41 }
0x17d9   :  { %1702 = vrot.lane.b32.xlu1 %v2368_v63, %s2372_s16 }
0x17db   :  { %v1502_v37 = vpop.permute.xlu0 %1501 }
0x17dc   :  { %1764 = vst.msk [vmem:[%s2875_s4 + $0x30] sm:$0xff] %vm24_vm0, %v1502_v37 }
0x17dd   :  { %471 = vrot.lane.b32.xlu1 %v2612_v60, %s2373_s19 }
0x17df   :  { %v1716_v39 = vpop.permute.xlu0 %1715 }
0x17e0   :  { %1718 = vst.msk [vmem:[%s2871_s6] sm:$0xff] %vm24_vm0, %v1716_v39 }
0x17e1   :  { %883 = vrot.lane.b32.xlu1 %v2696_v20, %s2373_s19 }
0x17e5   :  { %1295 = vrot.lane.b32.xlu1 %v2773_v44, %s2373_s19 }
0x184b   :  { %v1703_v40 = vpop.permute.xlu1 %1702 }
0x184c   :  { %v1705_v42 = vmul.f32 %v1703_v40, %v1687_v29 }
0x184e   :  { %1707 = vrot.lane.b32.xlu1 %v1705_v42, %s2373_s19 }
0x184f   :  { %v472_v43 = vpop.permute.xlu1 %471 }
0x1850   :  { %1744 = vst.msk [vmem:[%s2875_s4 + $0x8] sm:$0xff] %vm24_vm0, %v472_v43 }
0x1852   :  { %1720 = vrot.lane.b32.xlu1 %v1699_v35, %s2374_s8 }
0x1853   :  { %v884_v60 = vpop.permute.xlu1 %883 }
0x1854   :  { %1752 = vst.msk [vmem:[%s2875_s4 + $0x18] sm:$0xff] %vm24_vm0, %v884_v60 }
0x1857   :  { %v1296_v20 = vpop.permute.xlu1 %1295 }
0x1858   :  { %1760 = vst.msk [vmem:[%s2875_s4 + $0x28] sm:$0xff] %vm24_vm0, %v1296_v20 }
0x18c0   :  { %v1708_v44 = vpop.permute.xlu1 %1707 }
0x18c1   :  { %1768 = vst.msk [vmem:[%s2875_s4 + $0x38] sm:$0xff] %vm24_vm0, %v1708_v44  ;;  %1769 = vst.msk [vmem:[%s2870_s5 + $0x8] sm:$0xff] %vm24_vm0, %v1708_v44 }
0x18c4   :  { %v1721_v46 = vpop.permute.xlu1 %1720 }
0x18c5   :  { %1770 = vst.msk [vmem:[%s2871_s6 + $0x8] sm:$0xff] %vm24_vm0, %v1721_v46 }

</bundles_post_ra>
